<compile_context>
chip_gen: v7x
topology: tpu7x:2x2x1
jax: 0.10.0
libtpu: 0.0.40
codegen_flags: <defaults>
</compile_context>

<pallas_src>
import jax
import jax.numpy as jnp
import numpy as np
from jax.experimental import pallas as pl
from jax.experimental.pallas import tpu as pltpu

K = 5            # conv kernel size
STRIDE = 2       # conv stride
OUT_LANES = 128  # fc2 padded output width -> unmasked, lane-dense output store


def _conv_out_len(t):
    return (t - K) // STRIDE + 1


def _round_up(v, m):
    return (v + m - 1) // m * m


def _make_kernel(nb, h1h, h2, h3, t3):
    """Kernel closure over static (multiple-of-8) tile sizes."""

    def kernel(x_ref,                     # (2, nb, h1h, K) phase-split conv1 tap stack
               w1_ref, b1_ref,            # (K, 16), (1, 16)
               w2_ref, b2_ref,            # (K*16, 32), (1, 32)
               w3_ref, b3_ref,            # (K*32, 64), (1, 64)
               fw1_ref, fb1_ref,          # (64, 32) [scaled by 1/T3], (1, 32)
               fw2_ref, fb2_ref,          # (32, 128) [col 0 real], (1, 128)
               out_ref,                   # (1, nb, 128)
               h1_ref, h2_ref):           # VMEM scratch (2, nb, h1h, 16), (nb, h2, 32)
        # ---- Conv1d(1,16,k=5,s=2) + ReLU: ONE MXU matmul, M = 2*nb*h1h -------
        xt = x_ref[...].reshape(2 * nb * h1h, K)          # layout-free (h1h % 8 == 0)
        h1 = jnp.dot(xt, w1_ref[...], preferred_element_type=jnp.float32)
        h1 = jnp.maximum(h1 + b1_ref[...], 0.0)
        h1_ref[...] = h1.reshape(2, nb, h1h, 16)          # stored phase-split (t even/odd)

        # ---- Conv1d(16,32,k=5,s=2) + ReLU: 5 contiguous tap views (phase-split
        #      h1 makes tap j contiguous at phase j%2, offset j//2) fused into
        #      ONE (nb*h2, 80) @ (80, 32) matmul. -----------------------------
        taps2 = [h1_ref[j % 2, :, pl.ds(j // 2, h2), :] for j in range(K)]
        a2 = jnp.concatenate(taps2, axis=-1)              # (nb, h2, 80)
        a2 = a2.reshape(nb * h2, K * 16)                  # layout-free (h2 % 8 == 0)
        z2 = jnp.dot(a2, w2_ref[...], preferred_element_type=jnp.float32)
        h2_ref[...] = jnp.maximum(z2 + b2_ref[...], 0.0).reshape(nb, h2, 32)

        # ---- Conv1d(32,64,k=5,s=2) + ReLU: 5 stride-2 tap views, ONE matmul --
        taps3 = [h2_ref[:, pl.ds(j, h3, STRIDE), :] for j in range(K)]
        a3 = jnp.concatenate(taps3, axis=-1).reshape(nb * h3, K * 32)
        z3 = jnp.dot(a3, w3_ref[...], preferred_element_type=jnp.float32)
        h3v = jnp.maximum(z3 + b3_ref[...], 0.0).reshape(nb, h3, 64)

        # ---- AdaptiveAvgPool1d(1): 1/T3 folded into fw1; only the T3 valid
        #      time rows are summed (rows >= T3 are padding garbage). ---------
        pooled = jnp.sum(h3v[:, :t3, :], axis=1)          # (nb, 64)

        # ---- Linear(64,32) + ReLU -> Linear(32,1) padded to 128 lanes --------
        f1 = jnp.maximum(
            jnp.dot(pooled, fw1_ref[...], preferred_element_type=jnp.float32)
            + fb1_ref[...], 0.0)                          # (nb, 32)
        y = (jnp.dot(f1, fw2_ref[...], preferred_element_type=jnp.float32)
             + fb2_ref[...])                              # (nb, 128); col 0 = score
        out_ref[...] = y.reshape(1, nb, OUT_LANES)        # full-width unmasked store

    return kernel


def init_params(key):
    ks = jax.random.split(key, 10)
    scale = 0.1
    return {
        "w1": jax.random.normal(ks[0], (16, 1, K), jnp.float32) * scale,
        "b1": jax.random.normal(ks[1], (16,), jnp.float32) * scale,
        "w2": jax.random.normal(ks[2], (32, 16, K), jnp.float32) * scale,
        "b2": jax.random.normal(ks[3], (32,), jnp.float32) * scale,
        "w3": jax.random.normal(ks[4], (64, 32, K), jnp.float32) * scale,
        "b3": jax.random.normal(ks[5], (64,), jnp.float32) * scale,
        "fw1": jax.random.normal(ks[6], (32, 64), jnp.float32) * scale,
        "fb1": jax.random.normal(ks[7], (32,), jnp.float32) * scale,
        "fw2": jax.random.normal(ks[8], (1, 32), jnp.float32) * scale,
        "fb2": jax.random.normal(ks[9], (1,), jnp.float32) * scale,
    }


def grammar_score_forward(x_ncl, params, *, nb=4):
    """x_ncl: (B, 1, L) float32 (PyTorch NCL layout). Returns (B,) float32."""
    B, C, L = x_ncl.shape
    assert C == 1
    T1 = _conv_out_len(L)
    T2 = _conv_out_len(T1)
    T3 = _conv_out_len(T2)
    assert T3 >= 1, f"sequence length L={L} too short for 3 convs (need L >= 29)"

    # Padded time extents (multiples of 8 -> every (batch,time)->M reshape is
    # layout-free).  Sized so all in-bounds reads of padded rows only feed
    # output rows that are themselves padding (never the pooled sum).
    H3 = _round_up(T3, 8)
    H2 = _round_up(max(T2, STRIDE * (H3 - 1) + K), 8)
    H1h = _round_up(max((T1 + 1) // 2, H2 + (K - 1) // STRIDE), 8)

    nb = max(1, min(nb, B))
    B_pad = _round_up(B, nb)
    n_blocks = B_pad // nb

    x = x_ncl[:, 0, :].astype(jnp.float32)                     # (B, L) lane-dense
    if B_pad != B:
        x = jnp.concatenate([x, jnp.zeros((B_pad - B, L), jnp.float32)], axis=0)

    # Wrapper-side layout plumbing (pure gather, no compute): phase-split im2col
    # for conv1:  x_taps[p, b, u, j] = x[b, 2*(2u+p) + j], zero for 2u+p >= T1.
    u = jnp.arange(H1h)
    p = jnp.arange(2)
    t_out = 2 * u[None, :] + p[:, None]                        # (2, H1h) conv1 time
    src = STRIDE * t_out[:, :, None] + jnp.arange(K)[None, None, :]   # (2, H1h, K)
    valid = (t_out < T1).astype(jnp.float32)                   # (2, H1h)
    x_taps = jnp.take(x, jnp.clip(src, 0, L - 1).reshape(-1), axis=1)
    x_taps = x_taps.reshape(B_pad, 2, H1h, K) * valid[None, :, :, None]
    x_taps = jnp.transpose(x_taps, (1, 0, 2, 3))               # (2, B_pad, H1h, K)

    # Per-tap stacked conv weights (K*Cin, Cout): row index = j*Cin + ci.
    w1 = jnp.transpose(params["w1"], (2, 1, 0))[:, 0, :]       # (5, 16)
    w2 = jnp.transpose(params["w2"], (2, 1, 0)).reshape(K * 16, 32)   # (80, 32)
    w3 = jnp.transpose(params["w3"], (2, 1, 0)).reshape(K * 32, 64)   # (160, 64)
    b1 = params["b1"].reshape(1, -1)
    b2 = params["b2"].reshape(1, -1)
    b3 = params["b3"].reshape(1, -1)
    # FC weights pre-transposed to (in, out); fold AdaptiveAvgPool's 1/T3 into
    # fw1; pad fc2 to 128 output lanes so the output store is unmasked.
    fw1 = params["fw1"].T / float(T3)                          # (64, 32)
    fb1 = params["fb1"].reshape(1, -1)                         # (1, 32)
    fw2 = jnp.zeros((32, OUT_LANES), jnp.float32).at[:, 0].set(params["fw2"][0])
    fb2 = jnp.zeros((1, OUT_LANES), jnp.float32).at[0, 0].set(params["fb2"][0])

    kernel = _make_kernel(nb, H1h, H2, H3, T3)
    vmem = pl.BlockSpec(memory_space=pltpu.MemorySpace.VMEM)   # small, whole-array
    flops = 2 * B_pad * (2 * H1h * K * 16 + H2 * (K * 16) * 32
                         + H3 * (K * 32) * 64 + 64 * 32 + 32 * OUT_LANES)
    bytes_accessed = 4 * (int(x_taps.size) + int(w1.size) + int(w2.size)
                          + int(w3.size) + int(fw1.size) + int(fw2.size)
                          + 16 + 32 + 64 + 32 + OUT_LANES
                          + n_blocks * nb * OUT_LANES)

    out = pl.pallas_call(
        kernel,
        out_shape=jax.ShapeDtypeStruct((n_blocks, nb, OUT_LANES), jnp.float32),
        grid=(n_blocks,),
        in_specs=[pl.BlockSpec((2, nb, H1h, K), lambda b: (0, b, 0, 0))]
                 + [vmem] * 10,
        out_specs=pl.BlockSpec((1, nb, OUT_LANES), lambda b: (b, 0, 0)),
        scratch_shapes=[
            pltpu.VMEM((2, nb, H1h, 16), jnp.float32),
            pltpu.VMEM((nb, H2, 32), jnp.float32),
        ],
        compiler_params=pltpu.CompilerParams(
            dimension_semantics=("parallel",),
            vmem_limit_bytes=32 * 1024 * 1024),
        cost_estimate=pl.CostEstimate(
            flops=flops, transcendentals=0, bytes_accessed=bytes_accessed),
    )(x_taps, w1, b1, w2, b2, w3, b3, fw1, fb1, fw2, fb2)

    return out[:, :, 0].reshape(B_pad)[:B]                     # (B,)


def grammar_score_ref(x_ncl, params):
    """Pure-JAX reference mirroring the PyTorch module exactly."""

    def conv1d(x, w, b):  # x: (B, Cin, T), w: (Cout, Cin, K)
        y = jax.lax.conv_general_dilated(
            x, w, window_strides=(STRIDE,), padding="VALID",
            dimension_numbers=("NCH", "OIH", "NCH"),
        )
        return y + b[None, :, None]

    h = jax.nn.relu(conv1d(x_ncl, params["w1"], params["b1"]))
    h = jax.nn.relu(conv1d(h, params["w2"], params["b2"]))
    h = jax.nn.relu(conv1d(h, params["w3"], params["b3"]))
    h = jnp.mean(h, axis=-1)  # AdaptiveAvgPool1d(1) + squeeze
    h = jax.nn.relu(h @ params["fw1"].T + params["fb1"])
    return (h @ params["fw2"].T + params["fb2"])[:, 0]


if __name__ == "__main__":
    B, L = 8, 64   # grid = B // nb = 2 steps -> both v7x TensorCores get work
    key = jax.random.PRNGKey(0)
    kx, kp = jax.random.split(key)
    x = jax.random.normal(kx, (B, 1, L), jnp.float32)
    params = init_params(kp)

    out = jax.block_until_ready(grammar_score_forward(x, params, nb=4))
    ref = jax.block_until_ready(grammar_score_ref(x, params))

    assert out.shape == (B,)
    assert np.allclose(np.asarray(out), np.asarray(ref), rtol=1e-4, atol=1e-5), (
        np.asarray(out), np.asarray(ref))
    print("KERNEL_OK")
</pallas_src>

<mosaic_0001>
module attributes {stable_mosaic.version = 11 : i64} {
  func.func @kernel(%arg0: i32, %arg1: memref<2x4x32x5xf32, #tpu.memory_space<vmem>>, %arg2: memref<5x16xf32, #tpu.memory_space<vmem>>, %arg3: memref<1x16xf32, #tpu.memory_space<vmem>>, %arg4: memref<80x32xf32, #tpu.memory_space<vmem>>, %arg5: memref<1x32xf32, #tpu.memory_space<vmem>>, %arg6: memref<160x64xf32, #tpu.memory_space<vmem>>, %arg7: memref<1x64xf32, #tpu.memory_space<vmem>>, %arg8: memref<64x32xf32, #tpu.memory_space<vmem>>, %arg9: memref<1x32xf32, #tpu.memory_space<vmem>>, %arg10: memref<32x128xf32, #tpu.memory_space<vmem>>, %arg11: memref<1x128xf32, #tpu.memory_space<vmem>>, %arg12: memref<1x4x128xf32, #tpu.memory_space<vmem>>, %arg13: memref<2x4x32x16xf32, #tpu.memory_space<vmem>>, %arg14: memref<4x24x32xf32, #tpu.memory_space<vmem>>) attributes {dimension_semantics = [#tpu.dimension_semantics<parallel>], iteration_bounds = array<i64: 2>, scalar_prefetch = 0 : i64, scratch_operands = 2 : i64, tpu.core_type = #tpu.core_type<tc>, window_params = [{transform_indices = @transform_0, window_bounds = array<i64: 2, 4, 32, 5>}, {pipeline_mode = #tpu.pipeline_mode<synchronous>, transform_indices = @transform_1, window_bounds = array<i64: 5, 16>}, {pipeline_mode = #tpu.pipeline_mode<synchronous>, transform_indices = @transform_2, window_bounds = array<i64: 1, 16>}, {pipeline_mode = #tpu.pipeline_mode<synchronous>, transform_indices = @transform_3, window_bounds = array<i64: 80, 32>}, {pipeline_mode = #tpu.pipeline_mode<synchronous>, transform_indices = @transform_4, window_bounds = array<i64: 1, 32>}, {pipeline_mode = #tpu.pipeline_mode<synchronous>, transform_indices = @transform_5, window_bounds = array<i64: 160, 64>}, {pipeline_mode = #tpu.pipeline_mode<synchronous>, transform_indices = @transform_6, window_bounds = array<i64: 1, 64>}, {pipeline_mode = #tpu.pipeline_mode<synchronous>, transform_indices = @transform_7, window_bounds = array<i64: 64, 32>}, {pipeline_mode = #tpu.pipeline_mode<synchronous>, transform_indices = @transform_8, window_bounds = array<i64: 1, 32>}, {pipeline_mode = #tpu.pipeline_mode<synchronous>, transform_indices = @transform_9, window_bounds = array<i64: 32, 128>}, {pipeline_mode = #tpu.pipeline_mode<synchronous>, transform_indices = @transform_10, window_bounds = array<i64: 1, 128>}, {transform_indices = @transform_11, window_bounds = array<i64: 1, 4, 128>}]} {
    %c0 = arith.constant 0 : index
    %c0_0 = arith.constant 0 : index
    %c0_1 = arith.constant 0 : index
    %c0_2 = arith.constant 0 : index
    %0 = vector.load %arg1[%c0, %c0_0, %c0_1, %c0_2] : memref<2x4x32x5xf32, #tpu.memory_space<vmem>>, vector<2x4x32x5xf32>
    %1 = vector.shape_cast %0 : vector<2x4x32x5xf32> to vector<256x5xf32>
    %c0_3 = arith.constant 0 : index
    %c0_4 = arith.constant 0 : index
    %2 = vector.load %arg2[%c0_3, %c0_4] : memref<5x16xf32, #tpu.memory_space<vmem>>, vector<5x16xf32>
    %cst = arith.constant dense<0.000000e+00> : vector<256x16xf32>
    %3 = tpu.matmul %1, %2, %cst {dimension_numbers = #tpu.dot_dimension_numbers<[1], [0], [0], [1], [0, 0, 1, 1], [], []>} : vector<256x5xf32>, vector<5x16xf32>, vector<256x16xf32> -> vector<256x16xf32>
    %c0_5 = arith.constant 0 : index
    %c0_6 = arith.constant 0 : index
    %4 = vector.load %arg3[%c0_5, %c0_6] : memref<1x16xf32, #tpu.memory_space<vmem>>, vector<1x16xf32>
    %5 = vector.broadcast %4 : vector<1x16xf32> to vector<256x16xf32>
    %6 = arith.addf %3, %5 : vector<256x16xf32>
    %cst_7 = arith.constant 0.000000e+00 : f32
    %7 = vector.broadcast %cst_7 : f32 to vector<256x16xf32>
    %8 = arith.maximumf %6, %7 : vector<256x16xf32>
    %9 = vector.shape_cast %8 : vector<256x16xf32> to vector<2x4x32x16xf32>
    %c0_8 = arith.constant 0 : index
    %c0_9 = arith.constant 0 : index
    %c0_10 = arith.constant 0 : index
    %c0_11 = arith.constant 0 : index
    %10 = vector.load %arg13[%c0_8, %c0_9, %c0_10, %c0_11] : memref<2x4x32x16xf32, #tpu.memory_space<vmem>>, vector<2x4x32x16xf32>
    tpu.vector_store %arg13[%c0_8, %c0_9, %c0_10, %c0_11], %9 {strides = array<i32>} : memref<2x4x32x16xf32, #tpu.memory_space<vmem>>, vector<2x4x32x16xf32>,
    %c0_12 = arith.constant 0 : index
    %c0_13 = arith.constant 0 : index
    %c0_14 = arith.constant 0 : index
    %c0_15 = arith.constant 0 : index
    %11 = vector.load %arg13[%c0_12, %c0_13, %c0_14, %c0_15] : memref<2x4x32x16xf32, #tpu.memory_space<vmem>>, vector<1x4x24x16xf32>
    %12 = vector.shape_cast %11 : vector<1x4x24x16xf32> to vector<4x24x16xf32>
    %c1 = arith.constant 1 : index
    %c0_16 = arith.constant 0 : index
    %c0_17 = arith.constant 0 : index
    %c0_18 = arith.constant 0 : index
    %13 = vector.load %arg13[%c1, %c0_16, %c0_17, %c0_18] : memref<2x4x32x16xf32, #tpu.memory_space<vmem>>, vector<1x4x24x16xf32>
    %14 = vector.shape_cast %13 : vector<1x4x24x16xf32> to vector<4x24x16xf32>
    %c0_19 = arith.constant 0 : index
    %c0_20 = arith.constant 0 : index
    %c1_21 = arith.constant 1 : index
    %c0_22 = arith.constant 0 : index
    %15 = vector.load %arg13[%c0_19, %c0_20, %c1_21, %c0_22] : memref<2x4x32x16xf32, #tpu.memory_space<vmem>>, vector<1x4x24x16xf32>
    %16 = vector.shape_cast %15 : vector<1x4x24x16xf32> to vector<4x24x16xf32>
    %c1_23 = arith.constant 1 : index
    %c0_24 = arith.constant 0 : index
    %c1_25 = arith.constant 1 : index
    %c0_26 = arith.constant 0 : index
    %17 = vector.load %arg13[%c1_23, %c0_24, %c1_25, %c0_26] : memref<2x4x32x16xf32, #tpu.memory_space<vmem>>, vector<1x4x24x16xf32>
    %18 = vector.shape_cast %17 : vector<1x4x24x16xf32> to vector<4x24x16xf32>
    %c0_27 = arith.constant 0 : index
    %c0_28 = arith.constant 0 : index
    %c2 = arith.constant 2 : index
    %c0_29 = arith.constant 0 : index
    %19 = vector.load %arg13[%c0_27, %c0_28, %c2, %c0_29] : memref<2x4x32x16xf32, #tpu.memory_space<vmem>>, vector<1x4x24x16xf32>
    %20 = vector.shape_cast %19 : vector<1x4x24x16xf32> to vector<4x24x16xf32>
    %21 = tpu.concatenate %12, %14, %16, %18, %20 in 2 : vector<4x24x16xf32>, vector<4x24x16xf32>, vector<4x24x16xf32>, vector<4x24x16xf32>, vector<4x24x16xf32> -> vector<4x24x80xf32>
    %22 = vector.shape_cast %21 : vector<4x24x80xf32> to vector<96x80xf32>
    %c0_30 = arith.constant 0 : index
    %c0_31 = arith.constant 0 : index
    %23 = vector.load %arg4[%c0_30, %c0_31] : memref<80x32xf32, #tpu.memory_space<vmem>>, vector<80x32xf32>
    %cst_32 = arith.constant dense<0.000000e+00> : vector<96x32xf32>
    %24 = tpu.matmul %22, %23, %cst_32 {dimension_numbers = #tpu.dot_dimension_numbers<[1], [0], [0], [1], [0, 0, 1, 1], [], []>} : vector<96x80xf32>, vector<80x32xf32>, vector<96x32xf32> -> vector<96x32xf32>
    %c0_33 = arith.constant 0 : index
    %c0_34 = arith.constant 0 : index
    %25 = vector.load %arg5[%c0_33, %c0_34] : memref<1x32xf32, #tpu.memory_space<vmem>>, vector<1x32xf32>
    %26 = vector.broadcast %25 : vector<1x32xf32> to vector<96x32xf32>
    %27 = arith.addf %24, %26 : vector<96x32xf32>
    %cst_35 = arith.constant 0.000000e+00 : f32
    %28 = vector.broadcast %cst_35 : f32 to vector<96x32xf32>
    %29 = arith.maximumf %27, %28 : vector<96x32xf32>
    %30 = vector.shape_cast %29 : vector<96x32xf32> to vector<4x24x32xf32>
    %c0_36 = arith.constant 0 : index
    %c0_37 = arith.constant 0 : index
    %c0_38 = arith.constant 0 : index
    %31 = vector.load %arg14[%c0_36, %c0_37, %c0_38] : memref<4x24x32xf32, #tpu.memory_space<vmem>>, vector<4x24x32xf32>
    tpu.vector_store %arg14[%c0_36, %c0_37, %c0_38], %30 {strides = array<i32>} : memref<4x24x32xf32, #tpu.memory_space<vmem>>, vector<4x24x32xf32>,
    %c0_39 = arith.constant 0 : index
    %c0_40 = arith.constant 0 : index
    %c0_41 = arith.constant 0 : index
    %32 = tpu.strided_load %arg14[%c0_39, %c0_40, %c0_41] {strides = array<i32: 1, 2, 1>} : memref<4x24x32xf32, #tpu.memory_space<vmem>>, vector<4x8x32xf32>
    %c0_42 = arith.constant 0 : index
    %c1_43 = arith.constant 1 : index
    %c0_44 = arith.constant 0 : index
    %33 = tpu.strided_load %arg14[%c0_42, %c1_43, %c0_44] {strides = array<i32: 1, 2, 1>} : memref<4x24x32xf32, #tpu.memory_space<vmem>>, vector<4x8x32xf32>
    %c0_45 = arith.constant 0 : index
    %c2_46 = arith.constant 2 : index
    %c0_47 = arith.constant 0 : index
    %34 = tpu.strided_load %arg14[%c0_45, %c2_46, %c0_47] {strides = array<i32: 1, 2, 1>} : memref<4x24x32xf32, #tpu.memory_space<vmem>>, vector<4x8x32xf32>
    %c0_48 = arith.constant 0 : index
    %c3 = arith.constant 3 : index
    %c0_49 = arith.constant 0 : index
    %35 = tpu.strided_load %arg14[%c0_48, %c3, %c0_49] {strides = array<i32: 1, 2, 1>} : memref<4x24x32xf32, #tpu.memory_space<vmem>>, vector<4x8x32xf32>
    %c0_50 = arith.constant 0 : index
    %c4 = arith.constant 4 : index
    %c0_51 = arith.constant 0 : index
    %36 = tpu.strided_load %arg14[%c0_50, %c4, %c0_51] {strides = array<i32: 1, 2, 1>} : memref<4x24x32xf32, #tpu.memory_space<vmem>>, vector<4x8x32xf32>
    %37 = tpu.concatenate %32, %33, %34, %35, %36 in 2 : vector<4x8x32xf32>, vector<4x8x32xf32>, vector<4x8x32xf32>, vector<4x8x32xf32>, vector<4x8x32xf32> -> vector<4x8x160xf32>
    %38 = vector.shape_cast %37 : vector<4x8x160xf32> to vector<32x160xf32>
    %c0_52 = arith.constant 0 : index
    %c0_53 = arith.constant 0 : index
    %39 = vector.load %arg6[%c0_52, %c0_53] : memref<160x64xf32, #tpu.memory_space<vmem>>, vector<160x64xf32>
    %cst_54 = arith.constant dense<0.000000e+00> : vector<32x64xf32>
    %40 = tpu.matmul %38, %39, %cst_54 {dimension_numbers = #tpu.dot_dimension_numbers<[1], [0], [0], [1], [0, 0, 1, 1], [], []>} : vector<32x160xf32>, vector<160x64xf32>, vector<32x64xf32> -> vector<32x64xf32>
    %c0_55 = arith.constant 0 : index
    %c0_56 = arith.constant 0 : index
    %41 = vector.load %arg7[%c0_55, %c0_56] : memref<1x64xf32, #tpu.memory_space<vmem>>, vector<1x64xf32>
    %42 = vector.broadcast %41 : vector<1x64xf32> to vector<32x64xf32>
    %43 = arith.addf %40, %42 : vector<32x64xf32>
    %cst_57 = arith.constant 0.000000e+00 : f32
    %44 = vector.broadcast %cst_57 : f32 to vector<32x64xf32>
    %45 = arith.maximumf %43, %44 : vector<32x64xf32>
    %46 = vector.shape_cast %45 : vector<32x64xf32> to vector<4x8x64xf32>
    %47 = vector.extract_strided_slice %46 {offsets = [0, 0, 0], sizes = [4, 5, 64], strides = [1, 1, 1]} : vector<4x8x64xf32> to vector<4x5x64xf32>
    %cst_58 = arith.constant dense<0.000000e+00> : vector<4x64xf32>
    %48 = vector.multi_reduction <add>, %47, %cst_58 [1] : vector<4x5x64xf32> to vector<4x64xf32>
    %c0_59 = arith.constant 0 : index
    %c0_60 = arith.constant 0 : index
    %49 = vector.load %arg8[%c0_59, %c0_60] : memref<64x32xf32, #tpu.memory_space<vmem>>, vector<64x32xf32>
    %cst_61 = arith.constant dense<0.000000e+00> : vector<4x32xf32>
    %50 = tpu.matmul %48, %49, %cst_61 {dimension_numbers = #tpu.dot_dimension_numbers<[1], [0], [0], [1], [0, 0, 1, 1], [], []>} : vector<4x64xf32>, vector<64x32xf32>, vector<4x32xf32> -> vector<4x32xf32>
    %c0_62 = arith.constant 0 : index
    %c0_63 = arith.constant 0 : index
    %51 = vector.load %arg9[%c0_62, %c0_63] : memref<1x32xf32, #tpu.memory_space<vmem>>, vector<1x32xf32>
    %52 = vector.broadcast %51 : vector<1x32xf32> to vector<4x32xf32>
    %53 = arith.addf %50, %52 : vector<4x32xf32>
    %cst_64 = arith.constant 0.000000e+00 : f32
    %54 = vector.broadcast %cst_64 : f32 to vector<4x32xf32>
    %55 = arith.maximumf %53, %54 : vector<4x32xf32>
    %c0_65 = arith.constant 0 : index
    %c0_66 = arith.constant 0 : index
    %56 = vector.load %arg10[%c0_65, %c0_66] : memref<32x128xf32, #tpu.memory_space<vmem>>, vector<32x128xf32>
    %cst_67 = arith.constant dense<0.000000e+00> : vector<4x128xf32>
    %57 = tpu.matmul %55, %56, %cst_67 {dimension_numbers = #tpu.dot_dimension_numbers<[1], [0], [0], [1], [0, 0, 1, 1], [], []>} : vector<4x32xf32>, vector<32x128xf32>, vector<4x128xf32> -> vector<4x128xf32>
    %c0_68 = arith.constant 0 : index
    %c0_69 = arith.constant 0 : index
    %58 = vector.load %arg11[%c0_68, %c0_69] : memref<1x128xf32, #tpu.memory_space<vmem>>, vector<1x128xf32>
    %59 = vector.broadcast %58 : vector<1x128xf32> to vector<4x128xf32>
    %60 = arith.addf %57, %59 : vector<4x128xf32>
    %61 = vector.shape_cast %60 : vector<4x128xf32> to vector<1x4x128xf32>
    %c0_70 = arith.constant 0 : index
    %c0_71 = arith.constant 0 : index
    %c0_72 = arith.constant 0 : index
    %62 = vector.load %arg12[%c0_70, %c0_71, %c0_72] : memref<1x4x128xf32, #tpu.memory_space<vmem>>, vector<1x4x128xf32>
    tpu.vector_store %arg12[%c0_70, %c0_71, %c0_72], %61 {strides = array<i32>} : memref<1x4x128xf32, #tpu.memory_space<vmem>>, vector<1x4x128xf32>,
    return
  }
  func.func @transform_0(%arg0: i32) -> (i32, i32, i32, i32) {
    %c0_i32 = arith.constant 0 : i32
    %c0_i32_0 = arith.constant 0 : i32
    %c0_i32_1 = arith.constant 0 : i32
    %c0_i32_2 = arith.constant 0 : i32
    return %c0_i32, %arg0, %c0_i32_0, %c0_i32_1 : i32, i32, i32, i32
  }
  func.func @transform_1(%arg0: i32) -> (i32, i32) {
    %c0_i32 = arith.constant 0 : i32
    %c0_i32_0 = arith.constant 0 : i32
    %c0_i32_1 = arith.constant 0 : i32
    return %c0_i32, %c0_i32_0 : i32, i32
  }
  func.func @transform_2(%arg0: i32) -> (i32, i32) {
    %c0_i32 = arith.constant 0 : i32
    %c0_i32_0 = arith.constant 0 : i32
    %c0_i32_1 = arith.constant 0 : i32
    return %c0_i32, %c0_i32_0 : i32, i32
  }
  func.func @transform_3(%arg0: i32) -> (i32, i32) {
    %c0_i32 = arith.constant 0 : i32
    %c0_i32_0 = arith.constant 0 : i32
    %c0_i32_1 = arith.constant 0 : i32
    return %c0_i32, %c0_i32_0 : i32, i32
  }
  func.func @transform_4(%arg0: i32) -> (i32, i32) {
    %c0_i32 = arith.constant 0 : i32
    %c0_i32_0 = arith.constant 0 : i32
    %c0_i32_1 = arith.constant 0 : i32
    return %c0_i32, %c0_i32_0 : i32, i32
  }
  func.func @transform_5(%arg0: i32) -> (i32, i32) {
    %c0_i32 = arith.constant 0 : i32
    %c0_i32_0 = arith.constant 0 : i32
    %c0_i32_1 = arith.constant 0 : i32
    return %c0_i32, %c0_i32_0 : i32, i32
  }
  func.func @transform_6(%arg0: i32) -> (i32, i32) {
    %c0_i32 = arith.constant 0 : i32
    %c0_i32_0 = arith.constant 0 : i32
    %c0_i32_1 = arith.constant 0 : i32
    return %c0_i32, %c0_i32_0 : i32, i32
  }
  func.func @transform_7(%arg0: i32) -> (i32, i32) {
    %c0_i32 = arith.constant 0 : i32
    %c0_i32_0 = arith.constant 0 : i32
    %c0_i32_1 = arith.constant 0 : i32
    return %c0_i32, %c0_i32_0 : i32, i32
  }
  func.func @transform_8(%arg0: i32) -> (i32, i32) {
    %c0_i32 = arith.constant 0 : i32
    %c0_i32_0 = arith.constant 0 : i32
    %c0_i32_1 = arith.constant 0 : i32
    return %c0_i32, %c0_i32_0 : i32, i32
  }
  func.func @transform_9(%arg0: i32) -> (i32, i32) {
    %c0_i32 = arith.constant 0 : i32
    %c0_i32_0 = arith.constant 0 : i32
    %c0_i32_1 = arith.constant 0 : i32
    return %c0_i32, %c0_i32_0 : i32, i32
  }
  func.func @transform_10(%arg0: i32) -> (i32, i32) {
    %c0_i32 = arith.constant 0 : i32
    %c0_i32_0 = arith.constant 0 : i32
    %c0_i32_1 = arith.constant 0 : i32
    return %c0_i32, %c0_i32_0 : i32, i32
  }
  func.func @transform_11(%arg0: i32) -> (i32, i32, i32) {
    %c0_i32 = arith.constant 0 : i32
    %c0_i32_0 = arith.constant 0 : i32
    %c0_i32_1 = arith.constant 0 : i32
    return %arg0, %c0_i32, %c0_i32_0 : i32, i32, i32
  }
}

</mosaic_0001>

<bundles_post_ra>
// kernel: tpu_custom_call.1
= control target key start
LH: loop header
LB: loop body
LE: loop exit
PB: predicated region body
PF: predicated region fallthrough
CT: control target
= control target key end

     0   :  { %s3198_s0 = inlined_call_operand.vmem [shape: f32[2,8,32,5], index: 0, kind: input, shape index: {}]   ;;  %s3199_s1 = inlined_call_operand.vmem [shape: f32[5,16], index: 1, kind: input, shape index: {}]   ;;  %s3200_s2 = inlined_call_operand.vmem [shape: f32[1,16], index: 2, kind: input, shape index: {}]   ;;  %s3201_s3 = inlined_call_operand.vmem [shape: f32[80,32], index: 3, kind: input, shape index: {}]   ;;  %s3202_s4 = inlined_call_operand.vmem [shape: f32[1,32], index: 4, kind: input, shape index: {}]   ;;  %s3203_s5 = inlined_call_operand.vmem [shape: f32[160,64], index: 5, kind: input, shape index: {}]   ;;  %s3204_s6 = inlined_call_operand.vmem [shape: f32[1,64], index: 6, kind: input, shape index: {}]   ;;  %s3205_s7 = inlined_call_operand.vmem [shape: f32[64,32], index: 7, kind: input, shape index: {}]   ;;  %s3206_s8 = inlined_call_operand.vmem [shape: f32[1,32], index: 8, kind: input, shape index: {}]   ;;  %s3207_s9 = inlined_call_operand.vmem [shape: f32[32,128], index: 9, kind: input, shape index: {}]   ;;  %s3208_s10 = inlined_call_operand.vmem [shape: f32[1,128], index: 10, kind: input, shape index: {}]   ;;  %s3209_s11 = inlined_call_operand.hbm [shape: f32[2,4,128], index: 11, kind: output, shape index: {}]  }
   0x1   :  { %3212 = sst [smem:[#allocation8_spill]] %s3198_s0 }
   0x2   :  { %16 = vsyncpa [#allocation6], 0 }
   0x3   :  { %18 = vsyncpa [#allocation6 + $0x1], 0  ;;  %s2525_s17 = smov 0   ;;  %s2527_s18 = smov 0  }
   0x4   :  { %s2529_s19 = smov 0   ;;  %s2531_s20 = smov 0  }
   0x5 LB: > { %s3210_s21 = sadd.s32 4294967295, %s2454_s20   ;;  %s2003_s22 = sadd.s32 4294967294, %s2454_s20   ;;  %s2454_s20 = sphi %s2531_s20, %s3221_s20   ;;  %s2450_s19 = sphi %s2529_s19, %s3220_s19   ;;  %s2446_s18 = sphi %s2527_s18, %s3219_s18   ;;  %s2442_s17 = sphi %s2525_s17, %s3218_s17  }
   0x6   : > { %s2548_s23 = sadd.s32 1, %s2454_s20   ;;  %s31_s24 = sadd.s32 1, %s2450_s19 }
   0x7   : > { %s28_s25 = ssub.s32 %s2454_s20, %s2548_s23  ;;  %p38_p0 = scmp.ne.s32.totalorder %s2450_s19, %s2446_s18 }
   0x8   : > { %p29_p1 = scmp.eq.s32.totalorder %s28_s25, 0  ;;  %p39_p2 = scmp.eq.s32.totalorder %s2454_s20, 0 }
   0x9   : > { %p278_p3 = scmp.eq.s32.totalorder %s3210_s21, 1  ;;  %p283_p4 = scmp.ne.s32.totalorder %s2446_s18, %s2442_s17 }
   0xa   : > { %s2561_s26 = scalar_select %p29_p1, %s2450_s19, %s31_s24  }
   0xb   : > { %p40_p5 = por %p39_p2, %p38_p0  ;;  %p2563_p6 = por %p278_p3, %p38_p0 }
   0xc   : > { %p284_p7 = scmp.eq.s32.totalorder %s2003_s22, 1  ;;  %p2005_p9 = scmp.ge.s32.totalorder %s2454_s20, 2 }
   0xe   : > { %p2567_p8 = por %p284_p7, %p283_p4  ;;  %330 = sbr.rel (%p2005_p9) target bundleno = 47 (0x2f), region = 56 }
  0x15   : > { %333 = sbr.rel (!%p40_p5) target bundleno = 47 (0x2f), region = 60  ;;  %s335_s29 = sand.u32 (%p40_p5), 1, %s2450_s19  }
  0x16   : > { %s2074_s30 = sshll.u32 (%p40_p5), %s2454_s20, 7  ;;  %s2006_s12 = sshll.u32 (%p40_p5), %s335_s29, 8 }
  0x17   : > { %s3215_s0 = sld [smem:[#allocation8_spill]] (%p40_p5)  ;;  %s2584_s16 = scalar_lea.vmem (%p40_p5), [#allocation4], %s2006_s12 }
  0x1d   : > { %s2579_s15 = scalar_lea.vmem %s3215_s0, %s2074_s30 }
  0x1e   : > { %v431_v0 = vld [vmem:[%s2579_s15] sm:$0xff]  ;;  %v433_v1 = vld [vmem:[%s2579_s15 + $0x8] sm:$0xff]  ;;  %v435_v2 = vld [vmem:[%s2579_s15 + $0x10] sm:$0xff] }
  0x1f   : > { %432 = vst [vmem:[%s2584_s16] sm:$0xff] %v431_v0  ;;  %434 = vst [vmem:[%s2584_s16 + $0x8] sm:$0xff] %v433_v1  ;;  %v437_v3 = vld [vmem:[%s2579_s15 + $0x18] sm:$0xff]  ;;  %v439_v4 = vld [vmem:[%s2579_s15 + $0x20] sm:$0xff] }
  0x20   : > { %436 = vst [vmem:[%s2584_s16 + $0x10] sm:$0xff] %v435_v2  ;;  %v441_v5 = vld [vmem:[%s2579_s15 + $0x28] sm:$0xff]  ;;  %438 = vst [vmem:[%s2584_s16 + $0x18] sm:$0xff] %v437_v3  ;;  %v443_v6 = vld [vmem:[%s2579_s15 + $0x30] sm:$0xff] }
  0x21   : > { %440 = vst [vmem:[%s2584_s16 + $0x20] sm:$0xff] %v439_v4  ;;  %442 = vst [vmem:[%s2584_s16 + $0x28] sm:$0xff] %v441_v5  ;;  %v445_v7 = vld [vmem:[%s2579_s15 + $0x38] sm:$0xff]  ;;  %v447_v8 = vld [vmem:[%s2579_s15 + $0x40] sm:$0xff] }
  0x22   : > { %444 = vst [vmem:[%s2584_s16 + $0x30] sm:$0xff] %v443_v6  ;;  %446 = vst [vmem:[%s2584_s16 + $0x38] sm:$0xff] %v445_v7  ;;  %v449_v9 = vld [vmem:[%s2579_s15 + $0x48] sm:$0xff]  ;;  %v451_v10 = vld [vmem:[%s2579_s15 + $0x50] sm:$0xff] }
  0x23   : > { %448 = vst [vmem:[%s2584_s16 + $0x40] sm:$0xff] %v447_v8  ;;  %v453_v11 = vld [vmem:[%s2579_s15 + $0x58] sm:$0xff]  ;;  %450 = vst [vmem:[%s2584_s16 + $0x48] sm:$0xff] %v449_v9  ;;  %v455_v12 = vld [vmem:[%s2579_s15 + $0x60] sm:$0xff] }
  0x24   : > { %452 = vst [vmem:[%s2584_s16 + $0x50] sm:$0xff] %v451_v10  ;;  %454 = vst [vmem:[%s2584_s16 + $0x58] sm:$0xff] %v453_v11  ;;  %v457_v13 = vld [vmem:[%s2579_s15 + $0x68] sm:$0xff]  ;;  %v459_v14 = vld [vmem:[%s2579_s15 + $0x70] sm:$0xff] }
  0x25   : > { %456 = vst [vmem:[%s2584_s16 + $0x60] sm:$0xff] %v455_v12  ;;  %458 = vst [vmem:[%s2584_s16 + $0x68] sm:$0xff] %v457_v13  ;;  %v461_v15 = vld [vmem:[%s2579_s15 + $0x78] sm:$0xff]  ;;  %v463_v16 = vld [vmem:[%s2579_s15 + $0x100] sm:$0xff] }
  0x26   : > { %460 = vst [vmem:[%s2584_s16 + $0x70] sm:$0xff] %v459_v14  ;;  %v465_v17 = vld [vmem:[%s2579_s15 + $0x108] sm:$0xff]  ;;  %462 = vst [vmem:[%s2584_s16 + $0x78] sm:$0xff] %v461_v15  ;;  %v467_v18 = vld [vmem:[%s2579_s15 + $0x110] sm:$0xff] }
  0x27   : > { %464 = vst [vmem:[%s2584_s16 + $0x80] sm:$0xff] %v463_v16  ;;  %466 = vst [vmem:[%s2584_s16 + $0x88] sm:$0xff] %v465_v17  ;;  %v469_v19 = vld [vmem:[%s2579_s15 + $0x118] sm:$0xff]  ;;  %v471_v20 = vld [vmem:[%s2579_s15 + $0x120] sm:$0xff] }
  0x28   : > { %468 = vst [vmem:[%s2584_s16 + $0x90] sm:$0xff] %v467_v18  ;;  %470 = vst [vmem:[%s2584_s16 + $0x98] sm:$0xff] %v469_v19  ;;  %v473_v21 = vld [vmem:[%s2579_s15 + $0x128] sm:$0xff]  ;;  %v475_v22 = vld [vmem:[%s2579_s15 + $0x130] sm:$0xff] }
  0x29   : > { %472 = vst [vmem:[%s2584_s16 + $0xa0] sm:$0xff] %v471_v20  ;;  %v477_v23 = vld [vmem:[%s2579_s15 + $0x138] sm:$0xff]  ;;  %474 = vst [vmem:[%s2584_s16 + $0xa8] sm:$0xff] %v473_v21  ;;  %v479_v24 = vld [vmem:[%s2579_s15 + $0x140] sm:$0xff] }
  0x2a   : > { %476 = vst [vmem:[%s2584_s16 + $0xb0] sm:$0xff] %v475_v22  ;;  %478 = vst [vmem:[%s2584_s16 + $0xb8] sm:$0xff] %v477_v23  ;;  %v481_v25 = vld [vmem:[%s2579_s15 + $0x148] sm:$0xff]  ;;  %v483_v26 = vld [vmem:[%s2579_s15 + $0x150] sm:$0xff] }
  0x2b   : > { %480 = vst [vmem:[%s2584_s16 + $0xc0] sm:$0xff] %v479_v24  ;;  %482 = vst [vmem:[%s2584_s16 + $0xc8] sm:$0xff] %v481_v25  ;;  %v485_v27 = vld [vmem:[%s2579_s15 + $0x158] sm:$0xff]  ;;  %v487_v28 = vld [vmem:[%s2579_s15 + $0x160] sm:$0xff] }
  0x2c   : > { %484 = vst [vmem:[%s2584_s16 + $0xd0] sm:$0xff] %v483_v26  ;;  %v489_v29 = vld [vmem:[%s2579_s15 + $0x168] sm:$0xff]  ;;  %486 = vst [vmem:[%s2584_s16 + $0xd8] sm:$0xff] %v485_v27  ;;  %v491_v30 = vld [vmem:[%s2579_s15 + $0x170] sm:$0xff] }
  0x2d   : > { %488 = vst [vmem:[%s2584_s16 + $0xe0] sm:$0xff] %v487_v28  ;;  %490 = vst [vmem:[%s2584_s16 + $0xe8] sm:$0xff] %v489_v29  ;;  %v493_v31 = vld [vmem:[%s2579_s15 + $0x178] sm:$0xff] }
  0x2e   : > { %492 = vst [vmem:[%s2584_s16 + $0xf0] sm:$0xff] %v491_v30  ;;  %494 = vst [vmem:[%s2584_s16 + $0xf8] sm:$0xff] %v493_v31 }
  0x2f PF: > { %p2010_p10 = scmp.ge.s32.totalorder %s2454_s20, 1  ;;  %p499_p11 = scmp.lt.s32.totalorder %s2454_s20, 3 }
  0x31   : > { %p500_p12 = pnand %p2010_p10, %p499_p11 }
  0x32   : > { %v578_v32 = vld [vmem:[%s3199_s1] sm:$0x1f] (!%p500_p12)  ;;  %vm683_vm0 = vcmask (!%p500_p12), 1044480   ;;  %s2653_s25 = sand.u32 (!%p500_p12), 1, %s2446_s18   ;;  %vm586_vm1 = vcmask (!%p500_p12), 39936   ;;  %vm944_vm2 = vcmask (!%p500_p12), 130048  }
  0x33   : > { %503 = sbr.rel (%p500_p12) target bundleno = 1515 (0x5eb), region = 98  ;;  %2144 = vmatprep.subr.msk.mxu0 (!%p500_p12), %vm683_vm0, %v578_v32  ;;  %s2011_s29 = sshll.u32 (!%p500_p12), %s2653_s25, 8  ;;  %v2725_v1 = vld [vmem:[%s3200_s2] ss:$0 sm:$0xff] (!%p500_p12)  ;;  %vm1242_vm3 = vcmask (!%p500_p12), 261120   ;;  %vm1255_vm4 = vcmask (!%p500_p12), 392192  }
  0x34   : > { %2145 = vmatpush3.msk.msra.mxu0 (!%p500_p12), %vm683_vm0, %v578_v32  ;;  %s2656_s30 = scalar_lea.vmem (!%p500_p12), [#allocation4], %s2011_s29  ;;  %s2456_s14 = smov (!%p500_p12), 64   ;;  %vm1298_vm5 = vcmask (!%p500_p12), 654336   ;;  %vm1268_vm6 = vcmask (!%p500_p12), 523264   ;;  %vm1579_vm7 = vcmask (!%p500_p12), 785408   ;;  %vm2462_vm8 = vmmov (!%p500_p12), 0  }
  0x35   : > { %v546_v33 = vld [vmem:[%s2656_s30] sm:$0xff] (!%p500_p12)  ;;  %v547_v34 = vld [vmem:[%s2656_s30 + $0x8] sm:$0xff] (!%p500_p12)  ;;  %v548_v35 = vld [vmem:[%s2656_s30 + $0x10] sm:$0xff] (!%p500_p12)  ;;  %s3211_s15 = smov (!%p500_p12), 32   ;;  %s2458_s16 = smov (!%p500_p12), 48   ;;  %vm1712_vm9 = vcmask (!%p500_p12), 520192  }
  0x36   : > { %2146 = vmatprep.mubr.msk.f32.mxu0 (!%p500_p12), %vm586_vm1, %v546_v33  ;;  %v549_v36 = vld [vmem:[%s2656_s30 + $0x18] sm:$0xff] (!%p500_p12)  ;;  %v550_v37 = vld [vmem:[%s2656_s30 + $0x20] sm:$0xff] (!%p500_p12)  ;;  %v551_v38 = vld [vmem:[%s2656_s30 + $0x28] sm:$0xff] (!%p500_p12)  ;;  %s2459_s22 = smov (!%p500_p12), 16   ;;  %s2461_s13 = smov (!%p500_p12), 96   ;;  %vm1760_vm10 = vcmask (!%p500_p12), 1041409  }
  0x37   : > { %2147 = vmatmul.mubr.msk.f32.vlgmr.msra.gmra.mrb[0].mxu0 (!%p500_p12), %vm586_vm1, %v547_v34  ;;  %v552_v39 = vld [vmem:[%s2656_s30 + $0x30] sm:$0xff] (!%p500_p12)  ;;  %v553_v40 = vld [vmem:[%s2656_s30 + $0x38] sm:$0xff] (!%p500_p12)  ;;  %v554_v41 = vld [vmem:[%s2656_s30 + $0x40] sm:$0xff] (!%p500_p12)  ;;  %s3216_s24 = smov (!%p500_p12), 32   ;;  %vm1762_vm11 = vcmask (!%p500_p12), 1042434   ;;  %vm1764_vm12 = vcmask (!%p500_p12), 1043459  }
  0x38   : > { %2149 = vmatprep.mubr.msk.f32.mxu0 (!%p500_p12), %vm586_vm1, %v548_v35  ;;  %v555_v42 = vld [vmem:[%s2656_s30 + $0x48] sm:$0xff] (!%p500_p12)  ;;  %v556_v43 = vld [vmem:[%s2656_s30 + $0x50] sm:$0xff] (!%p500_p12)  ;;  %v557_v44 = vld [vmem:[%s2656_s30 + $0x58] sm:$0xff] (!%p500_p12)  ;;  %s3217_s21 = sadd.s32 (!%p500_p12), 4294967295, %s2454_s20  }
  0x39   : > { %v558_v45 = vld [vmem:[%s2656_s30 + $0x60] sm:$0xff] (!%p500_p12)  ;;  %v559_v46 = vld [vmem:[%s2656_s30 + $0x68] sm:$0xff] (!%p500_p12)  ;;  %v560_v47 = vld [vmem:[%s2656_s30 + $0x70] sm:$0xff] (!%p500_p12)  ;;  %s2070_s29 = sshll.u32 (!%p500_p12), %s3217_s21, 6 }
  0x3a   : > { %v561_v48 = vld [vmem:[%s2656_s30 + $0x78] sm:$0xff]  ;;  %v562_v49 = vld [vmem:[%s2656_s30 + $0x80] sm:$0xff]  ;;  %v563_v50 = vld [vmem:[%s2656_s30 + $0x88] sm:$0xff] }
  0x3b   : > { %2150 = vmatmul.mubr.msk.f32.gmra.mrb[2].mxu0 %vm586_vm1, %v549_v36  ;;  %v564_v51 = vld [vmem:[%s2656_s30 + $0x90] sm:$0xff]  ;;  %v565_v52 = vld [vmem:[%s2656_s30 + $0x98] sm:$0xff]  ;;  %v566_v53 = vld [vmem:[%s2656_s30 + $0xa0] sm:$0xff] }
  0x3c   : > { %2152 = vmatprep.mubr.msk.f32.mxu0 %vm586_vm1, %v550_v37  ;;  %v567_v54 = vld [vmem:[%s2656_s30 + $0xa8] sm:$0xff]  ;;  %v568_v55 = vld [vmem:[%s2656_s30 + $0xb0] sm:$0xff]  ;;  %v569_v56 = vld [vmem:[%s2656_s30 + $0xb8] sm:$0xff] }
  0x3d   : > { %v570_v57 = vld [vmem:[%s2656_s30 + $0xc0] sm:$0xff]  ;;  %v571_v58 = vld [vmem:[%s2656_s30 + $0xc8] sm:$0xff]  ;;  %v572_v59 = vld [vmem:[%s2656_s30 + $0xd0] sm:$0xff] }
  0x3e   : > { %v573_v60 = vld [vmem:[%s2656_s30 + $0xd8] sm:$0xff]  ;;  %v574_v61 = vld [vmem:[%s2656_s30 + $0xe0] sm:$0xff]  ;;  %v575_v62 = vld [vmem:[%s2656_s30 + $0xe8] sm:$0xff] }
  0x3f   : > { %2153 = vmatmul.mubr.msk.f32.gmra.mrb[4].mxu0 %vm586_vm1, %v551_v38  ;;  %v576_v63 = vld [vmem:[%s2656_s30 + $0xf0] sm:$0xff]  ;;  %v577_v0 = vld [vmem:[%s2656_s30 + $0xf8] sm:$0xff] }
  0x40   : > { %2155 = vmatprep.mubr.msk.f32.mxu0 %vm586_vm1, %v552_v39 }
  0x43   : > { %2156 = vmatmul.mubr.msk.f32.gmra.mrb[6].mxu0 %vm586_vm1, %v553_v40 }
  0x44   : > { %2158 = vmatprep.mubr.msk.f32.mxu0 %vm586_vm1, %v554_v41 }
  0x47   : > { %2159 = vmatmul.mubr.msk.f32.gmra.mrb[8].mxu0 %vm586_vm1, %v555_v42 }
  0x48   : > { %2161 = vmatprep.mubr.msk.f32.mxu0 %vm586_vm1, %v556_v43 }
  0x4b   : > { %2162 = vmatmul.mubr.msk.f32.gmra.mrb[10].mxu0 %vm586_vm1, %v557_v44 }
  0x4c   : > { %2164 = vmatprep.mubr.msk.f32.mxu0 %vm586_vm1, %v558_v45 }
  0x4f   : > { %2165 = vmatmul.mubr.msk.f32.gmra.mrb[12].mxu0 %vm586_vm1, %v559_v46 }
  0x50   : > { %2167 = vmatprep.mubr.msk.f32.mxu0 %vm586_vm1, %v560_v47 }
  0x53   : > { %2168 = vmatmul.mubr.msk.f32.gmra.mrb[14].mxu0 %vm586_vm1, %v561_v48 }
  0x54   : > { %2170 = vmatprep.mubr.msk.f32.mxu0 %vm586_vm1, %v562_v49 }
  0x57   : > { %2171 = vmatmul.mubr.msk.f32.gmra.mrb[16].mxu0 %vm586_vm1, %v563_v50 }
  0x58   : > { %2173 = vmatprep.mubr.msk.f32.mxu0 %vm586_vm1, %v564_v51 }
  0x5b   : > { %2174 = vmatmul.mubr.msk.f32.gmra.mrb[18].mxu0 %vm586_vm1, %v565_v52 }
  0x5c   : > { %2176 = vmatprep.mubr.msk.f32.mxu0 %vm586_vm1, %v566_v53 }
  0x5f   : > { %2177 = vmatmul.mubr.msk.f32.gmra.mrb[20].mxu0 %vm586_vm1, %v567_v54 }
  0x60   : > { %2179 = vmatprep.mubr.msk.f32.mxu0 %vm586_vm1, %v568_v55 }
  0x63   : > { %2180 = vmatmul.mubr.msk.f32.gmra.mrb[22].mxu0 %vm586_vm1, %v569_v56 }
  0x64   : > { %2182 = vmatprep.mubr.msk.f32.mxu0 %vm586_vm1, %v570_v57 }
  0x67   : > { %2183 = vmatmul.mubr.msk.f32.gmra.mrb[24].mxu0 %vm586_vm1, %v571_v58 }
  0x68   : > { %2185 = vmatprep.mubr.msk.f32.mxu0 %vm586_vm1, %v572_v59 }
  0x6b   : > { %2186 = vmatmul.mubr.msk.f32.gmra.mrb[26].mxu0 %vm586_vm1, %v573_v60 }
  0x6c   : > { %2188 = vmatprep.mubr.msk.f32.mxu0 %vm586_vm1, %v574_v61 }
  0x6f   : > { %2189 = vmatmul.mubr.msk.f32.gmra.mrb[28].mxu0 %vm586_vm1, %v575_v62 }
  0x70   : > { %2191 = vmatprep.mubr.msk.f32.mxu0 %vm586_vm1, %v576_v63 }
  0x73   : > { %2192 = vmatmul.mubr.msk.f32.gmra.mrb[30].mxu0 %vm586_vm1, %v577_v0 }
 0x10a   : > { %v2148_v2 = vpop.f32.mrb[0].mxu0 }
 0x10b   : > { %v759_v3 = vadd.f32 %v2148_v2, %v2725_v1  ;;  %v753_v4 = vpop.f32.mrb[1].mxu0 }
 0x10c   : > { %v754_v5 = vadd.f32 %v2725_v1, %v753_v4 }
 0x10d   : > { %v913_v6 = vmax.f32 %v759_v3, 0.0 }
 0x10e   : > { %v912_v7 = vmax.f32 %v754_v5, 0.0  ;;  %v2151_v8 = vpop.f32.mrb[2].mxu0 }
 0x10f   : > { %946 = vst.msk [vmem:[#allocation2 + $0x8] sm:$0xff] %vm944_vm2, %v913_v6  ;;  %v769_v9 = vadd.f32 %v2151_v8, %v2725_v1  ;;  %v763_v10 = vpop.f32.mrb[3].mxu0 }
 0x110   : > { %945 = vst.msk [vmem:[#allocation2] sm:$0xff] %vm944_vm2, %v912_v7  ;;  %v764_v11 = vadd.f32 %v2725_v1, %v763_v10 }
 0x111   : > { %v915_v12 = vmax.f32 %v769_v9, 0.0 }
 0x112   : > { %v914_v13 = vmax.f32 %v764_v11, 0.0  ;;  %v2154_v14 = vpop.f32.mrb[4].mxu0 }
 0x113   : > { %948 = vst.msk [vmem:[#allocation2 + $0x18] sm:$0xff] %vm944_vm2, %v915_v12  ;;  %v779_v15 = vadd.f32 %v2154_v14, %v2725_v1  ;;  %v773_v16 = vpop.f32.mrb[5].mxu0 }
 0x114   : > { %947 = vst.msk [vmem:[#allocation2 + $0x10] sm:$0xff] %vm944_vm2, %v914_v13  ;;  %v774_v17 = vadd.f32 %v2725_v1, %v773_v16 }
 0x115   : > { %v917_v18 = vmax.f32 %v779_v15, 0.0 }
 0x116   : > { %v916_v19 = vmax.f32 %v774_v17, 0.0  ;;  %v2157_v20 = vpop.f32.mrb[6].mxu0 }
 0x117   : > { %950 = vst.msk [vmem:[#allocation2 + $0x28] sm:$0xff] %vm944_vm2, %v917_v18  ;;  %v789_v21 = vadd.f32 %v2157_v20, %v2725_v1  ;;  %v783_v22 = vpop.f32.mrb[7].mxu0  ;;  %v1026_v23 = vld [vmem:[#allocation2 + $0x2] sm:$0xff] }
 0x118   : > { %v1002_v24 = vld [vmem:[#allocation2 + $0x1] sm:$0xff]  ;;  %949 = vst.msk [vmem:[#allocation2 + $0x20] sm:$0xff] %vm944_vm2, %v916_v19  ;;  %v784_v25 = vadd.f32 %v2725_v1, %v783_v22  ;;  %1194 = vrot.lane.b32.xlu0 %v1026_v23, %s2456_s14 }
 0x119   : > { %1098 = vrot.lane.b32.xlu1 %v1002_v24, %s3211_s15  ;;  %v919_v26 = vmax.f32 %v789_v21, 0.0 }
 0x11a   : > { %v918_v27 = vmax.f32 %v784_v25, 0.0  ;;  %v2160_v28 = vpop.f32.mrb[8].mxu0 }
 0x11b   : > { %952 = vst.msk [vmem:[#allocation2 + $0x38] sm:$0xff] %vm944_vm2, %v919_v26  ;;  %v799_v29 = vadd.f32 %v2160_v28, %v2725_v1  ;;  %v793_v30 = vpop.f32.mrb[9].mxu0  ;;  %v1027_v31 = vld [vmem:[#allocation2 + $0xa] sm:$0xff]  ;;  %v1028_v47 = vld [vmem:[#allocation2 + $0x12] sm:$0xff] }
 0x11c   : > { %v1003_v32 = vld [vmem:[#allocation2 + $0x9] sm:$0xff]  ;;  %951 = vst.msk [vmem:[#allocation2 + $0x30] sm:$0xff] %vm944_vm2, %v918_v27  ;;  %v794_v33 = vadd.f32 %v2725_v1, %v793_v30  ;;  %1196 = vrot.lane.b32.xlu0 %v1027_v31, %s2456_s14  ;;  %v1004_v39 = vld [vmem:[#allocation2 + $0x11] sm:$0xff] }
 0x11d   : > { %1100 = vrot.lane.b32.xlu1 %v1003_v32, %s3211_s15  ;;  %v921_v34 = vmax.f32 %v799_v29, 0.0 }
 0x11e   : > { %v920_v35 = vmax.f32 %v794_v33, 0.0  ;;  %v2163_v36 = vpop.f32.mrb[10].mxu0  ;;  %v1281_v33 = vld [vmem:[%s3201_s3] sm:$0xff] }
 0x11f   : > { %954 = vst.msk [vmem:[#allocation2 + $0x48] sm:$0xff] %vm944_vm2, %v921_v34  ;;  %v809_v37 = vadd.f32 %v2163_v36, %v2725_v1  ;;  %v803_v38 = vpop.f32.mrb[11].mxu0  ;;  %v1005_v40 = vld [vmem:[#allocation2 + $0x21] sm:$0xff] }
 0x120   : > { %953 = vst.msk [vmem:[#allocation2 + $0x40] sm:$0xff] %vm944_vm2, %v920_v35  ;;  %v804_v41 = vadd.f32 %v2725_v1, %v803_v38  ;;  %1102 = vrot.lane.b32.xlu0 %v1004_v39, %s3211_s15  ;;  %v1029_v55 = vld [vmem:[#allocation2 + $0x22] sm:$0xff] }
 0x121   : > { %1104 = vrot.lane.b32.xlu1 %v1005_v40, %s3211_s15  ;;  %v923_v42 = vmax.f32 %v809_v37, 0.0  ;;  %v1282_v34 = vld [vmem:[%s3201_s3 + $0x8] sm:$0xff] }
 0x122   : > { %v922_v43 = vmax.f32 %v804_v41, 0.0  ;;  %v2166_v44 = vpop.f32.mrb[12].mxu0  ;;  %v2262_v36 = vpack.c.bf16 %v1282_v34, %v1281_v33 }
 0x123   : > { %956 = vst.msk [vmem:[#allocation2 + $0x58] sm:$0xff] %vm944_vm2, %v923_v42  ;;  %v819_v45 = vadd.f32 %v2166_v44, %v2725_v1  ;;  %v813_v46 = vpop.f32.mrb[13].mxu0  ;;  %v1007_v48 = vld [vmem:[#allocation2 + $0x31] sm:$0xff]  ;;  %v1006_v62 = vld [vmem:[#allocation2 + $0x29] sm:$0xff] }
 0x124   : > { %955 = vst.msk [vmem:[#allocation2 + $0x50] sm:$0xff] %vm944_vm2, %v922_v43  ;;  %v814_v49 = vadd.f32 %v2725_v1, %v813_v46  ;;  %1198 = vrot.lane.b32.xlu0 %v1028_v47, %s2456_s14  ;;  %v1030_v7 = vld [vmem:[#allocation2 + $0x2a] sm:$0xff]  ;;  %v1031_v14 = vld [vmem:[#allocation2 + $0x32] sm:$0xff]  ;;  %2263 = vmatprep.subr.bf16.mxu1 %v2262_v36 }
 0x125   : > { %1108 = vrot.lane.b32.xlu1 %v1007_v48, %s3211_s15  ;;  %v925_v50 = vmax.f32 %v819_v45, 0.0  ;;  %v1283_v43 = vld [vmem:[%s3201_s3 + $0x10] sm:$0xff]  ;;  %v1284_v45 = vld [vmem:[%s3201_s3 + $0x18] sm:$0xff]  ;;  %2265 = vmatpush3.bf16.msra.mxu1 %v2262_v36 }
 0x126   : > { %v924_v51 = vmax.f32 %v814_v49, 0.0  ;;  %v2169_v52 = vpop.f32.mrb[14].mxu0  ;;  %v2266_v48 = vpack.c.bf16 %v1284_v45, %v1283_v43 }
 0x127   : > { %958 = vst.msk [vmem:[#allocation2 + $0x68] sm:$0xff] %vm944_vm2, %v925_v50  ;;  %v829_v53 = vadd.f32 %v2169_v52, %v2725_v1  ;;  %v823_v54 = vpop.f32.mrb[15].mxu0  ;;  %v1008_v23 = vld [vmem:[#allocation2 + $0x41] sm:$0xff] }
 0x128   : > { %957 = vst.msk [vmem:[#allocation2 + $0x60] sm:$0xff] %vm944_vm2, %v924_v51  ;;  %v824_v56 = vadd.f32 %v2725_v1, %v823_v54  ;;  %1200 = vrot.lane.b32.xlu0 %v1029_v55, %s2456_s14  ;;  %v1032_v28 = vld [vmem:[#allocation2 + $0x42] sm:$0xff]  ;;  %2267 = vmatprep.subr.bf16.mxu1 %v2266_v48 }
 0x129   : > { %v927_v57 = vmax.f32 %v829_v53, 0.0  ;;  %v1285_v55 = vld [vmem:[%s3201_s3 + $0x20] sm:$0xff]  ;;  %2269 = vmatpush3.bf16.msra.mxu1 %v2266_v48 }
 0x12a   : > { %v926_v58 = vmax.f32 %v824_v56, 0.0  ;;  %v2172_v59 = vpop.f32.mrb[16].mxu0  ;;  %v1286_v56 = vld [vmem:[%s3201_s3 + $0x28] sm:$0xff] }
 0x12b   : > { %960 = vst.msk [vmem:[#allocation2 + $0x78] sm:$0xff] %vm944_vm2, %v927_v57  ;;  %v839_v60 = vadd.f32 %v2172_v59, %v2725_v1  ;;  %v833_v61 = vpop.f32.mrb[17].mxu0  ;;  %v1009_v63 = vld [vmem:[#allocation2 + $0x49] sm:$0xff]  ;;  %v1010_v51 = vld [vmem:[#allocation2 + $0x51] sm:$0xff] }
 0x12c   : > { %959 = vst.msk [vmem:[#allocation2 + $0x70] sm:$0xff] %vm944_vm2, %v926_v58  ;;  %v834_v0 = vadd.f32 %v2725_v1, %v833_v61  ;;  %1106 = vrot.lane.b32.xlu0 %v1006_v62, %s3211_s15  ;;  %1112 = vrot.lane.b32.xlu1 %v1009_v63, %s3211_s15  ;;  %v1033_v39 = vld [vmem:[#allocation2 + $0x4a] sm:$0xff]  ;;  %v2270_v58 = vpack.c.bf16 %v1286_v56, %v1285_v55  ;;  %v1034_v61 = vld [vmem:[#allocation2 + $0x52] sm:$0xff] }
 0x12d   : > { %v929_v2 = vmax.f32 %v839_v60, 0.0 }
 0x12e   : > { %v928_v3 = vmax.f32 %v834_v0, 0.0  ;;  %v2175_v4 = vpop.f32.mrb[18].mxu0  ;;  %2271 = vmatprep.subr.bf16.mxu1 %v2270_v58 }
 0x12f   : > { %962 = vst.msk [vmem:[#allocation2 + $0x88] sm:$0xff] %vm944_vm2, %v929_v2  ;;  %v849_v5 = vadd.f32 %v2175_v4, %v2725_v1  ;;  %v843_v6 = vpop.f32.mrb[19].mxu0  ;;  %v1011_v8 = vld [vmem:[#allocation2 + $0x61] sm:$0xff]  ;;  %v1288_v4 = vld [vmem:[%s3201_s3 + $0x38] sm:$0xff]  ;;  %2273 = vmatpush3.bf16.msra.mxu1 %v2270_v58 }
 0x130   : > { %961 = vst.msk [vmem:[#allocation2 + $0x80] sm:$0xff] %vm944_vm2, %v928_v3  ;;  %v844_v9 = vadd.f32 %v2725_v1, %v843_v6  ;;  %1202 = vrot.lane.b32.xlu0 %v1030_v7, %s2456_s14  ;;  %1116 = vrot.lane.b32.xlu1 %v1011_v8, %s3211_s15  ;;  %v1287_v3 = vld [vmem:[%s3201_s3 + $0x30] sm:$0xff]  ;;  %v1035_v8 = vld [vmem:[#allocation2 + $0x62] sm:$0xff] }
 0x131   : > { %v931_v10 = vmax.f32 %v849_v5, 0.0  ;;  %v2274_v6 = vpack.c.bf16 %v1288_v4, %v1287_v3  ;;  %v977_v4 = vld [vmem:[#allocation2] sm:$0xff] }
 0x132   : > { %v930_v11 = vmax.f32 %v844_v9, 0.0  ;;  %v2178_v12 = vpop.f32.mrb[20].mxu0 }
 0x133   : > { %964 = vst.msk [vmem:[#allocation2 + $0x98] sm:$0xff] %vm944_vm2, %v931_v10  ;;  %v859_v13 = vadd.f32 %v2178_v12, %v2725_v1  ;;  %v1013_v15 = vld [vmem:[#allocation2 + $0x71] sm:$0xff]  ;;  %v853_v16 = vpop.f32.mrb[21].mxu0  ;;  %2275 = vmatprep.subr.bf16.mxu1 %v2274_v6  ;;  %v1290_v10 = vld [vmem:[%s3201_s3 + $0x48] sm:$0xff] }
 0x134   : > { %963 = vst.msk [vmem:[#allocation2 + $0x90] sm:$0xff] %vm944_vm2, %v930_v11  ;;  %1204 = vrot.lane.b32.xlu0 %v1031_v14, %s2456_s14  ;;  %1120 = vrot.lane.b32.xlu1 %v1013_v15, %s3211_s15  ;;  %v854_v17 = vadd.f32 %v2725_v1, %v853_v16  ;;  %v1037_v33 = vld [vmem:[#allocation2 + $0x72] sm:$0xff] }
 0x135   : > { %v933_v18 = vmax.f32 %v859_v13, 0.0  ;;  %2277 = vmatpush3.bf16.msra.mxu1 %v2274_v6  ;;  %v1012_v13 = vld [vmem:[#allocation2 + $0x69] sm:$0xff] }
 0x136   : > { %v932_v19 = vmax.f32 %v854_v17, 0.0  ;;  %v2181_v20 = vpop.f32.mrb[22].mxu0  ;;  %v991_v14 = vld [vmem:[#allocation2 + $0x88] sm:$0xff] }
 0x137   : > { %966 = vst.msk [vmem:[#allocation2 + $0xa8] sm:$0xff] %vm944_vm2, %v933_v18  ;;  %v869_v21 = vadd.f32 %v2181_v20, %v2725_v1  ;;  %v863_v22 = vpop.f32.mrb[23].mxu0  ;;  %v990_v17 = vld [vmem:[#allocation2 + $0x80] sm:$0xff] }
 0x138   : > { %965 = vst.msk [vmem:[#allocation2 + $0xa0] sm:$0xff] %vm944_vm2, %v932_v19  ;;  %v864_v24 = vadd.f32 %v2725_v1, %v863_v22  ;;  %1110 = vrot.lane.b32.xlu0 %v1008_v23, %s3211_s15  ;;  %v1014_v18 = vld [vmem:[#allocation2 + $0x81] sm:$0xff] }
 0x139   : > { %v935_v25 = vmax.f32 %v869_v21, 0.0 }
 0x13a   : > { %v934_v26 = vmax.f32 %v864_v24, 0.0  ;;  %v2184_v27 = vpop.f32.mrb[24].mxu0 }
 0x13b   : > { %968 = vst.msk [vmem:[#allocation2 + $0xb8] sm:$0xff] %vm944_vm2, %v935_v25  ;;  %v1015_v29 = vld [vmem:[#allocation2 + $0x89] sm:$0xff]  ;;  %v879_v30 = vadd.f32 %v2184_v27, %v2725_v1  ;;  %v873_v31 = vpop.f32.mrb[25].mxu0  ;;  %v1016_v20 = vld [vmem:[#allocation2 + $0x91] sm:$0xff] }
 0x13c   : > { %967 = vst.msk [vmem:[#allocation2 + $0xb0] sm:$0xff] %vm944_vm2, %v934_v26  ;;  %1206 = vrot.lane.b32.xlu0 %v1032_v28, %s2456_s14  ;;  %1148 = vrot.lane.b32.xlu1 %v1015_v29, %s2458_s16  ;;  %v874_v32 = vadd.f32 %v2725_v1, %v873_v31  ;;  %v992_v40 = vld [vmem:[#allocation2 + $0x90] sm:$0xff] }
 0x13d   : > { %v937_v35 = vmax.f32 %v879_v30, 0.0  ;;  %v1036_v31 = vld [vmem:[#allocation2 + $0x6a] sm:$0xff] }
 0x13e   : > { %v936_v37 = vmax.f32 %v874_v32, 0.0  ;;  %v2187_v38 = vpop.f32.mrb[26].mxu0  ;;  %v994_v46 = vld [vmem:[#allocation2 + $0xa8] sm:$0xff] }
 0x13f   : > { %970 = vst.msk [vmem:[#allocation2 + $0xc8] sm:$0xff] %vm944_vm2, %v937_v35  ;;  %v889_v41 = vadd.f32 %v2187_v38, %v2725_v1  ;;  %v883_v42 = vpop.f32.mrb[27].mxu0  ;;  %v993_v62 = vld [vmem:[#allocation2 + $0xa0] sm:$0xff] }
 0x140   : > { %1208 = vrot.lane.b32.xlu0 %v1033_v39, %s2456_s14  ;;  %1054 = vrot.lane.b32.xlu1 %v992_v40, %s2459_s22  ;;  %969 = vst.msk [vmem:[#allocation2 + $0xc0] sm:$0xff] %vm944_vm2, %v936_v37  ;;  %v884_v44 = vadd.f32 %v2725_v1, %v883_v42  ;;  %v1017_v9 = vld [vmem:[#allocation2 + $0xa1] sm:$0xff] }
 0x141   : > { %v939_v47 = vmax.f32 %v889_v41, 0.0 }
 0x142   : > { %v938_v49 = vmax.f32 %v884_v44, 0.0  ;;  %v2190_v50 = vpop.f32.mrb[28].mxu0 }
 0x143   : > { %972 = vst.msk [vmem:[#allocation2 + $0xd8] sm:$0xff] %vm944_vm2, %v939_v47  ;;  %v899_v52 = vadd.f32 %v2190_v50, %v2725_v1  ;;  %v893_v53 = vpop.f32.mrb[29].mxu0  ;;  %v995_v11 = vld [vmem:[#allocation2 + $0xb0] sm:$0xff] }
 0x144   : > { %1114 = vrot.lane.b32.xlu0 %v1010_v51, %s3211_s15  ;;  %1058 = vrot.lane.b32.xlu1 %v994_v46, %s2459_s22  ;;  %971 = vst.msk [vmem:[#allocation2 + $0xd0] sm:$0xff] %vm944_vm2, %v938_v49  ;;  %v894_v54 = vadd.f32 %v2725_v1, %v893_v53  ;;  %v1019_v15 = vld [vmem:[#allocation2 + $0xb1] sm:$0xff]  ;;  %v1018_v22 = vld [vmem:[#allocation2 + $0xa9] sm:$0xff] }
 0x145   : > { %v941_v57 = vmax.f32 %v899_v52, 0.0 }
 0x146   : > { %v940_v59 = vmax.f32 %v894_v54, 0.0  ;;  %v2193_v60 = vpop.f32.mrb[30].mxu0  ;;  %v997_v16 = vld [vmem:[#allocation2 + $0xc8] sm:$0xff] }
 0x147   : > { %974 = vst.msk [vmem:[#allocation2 + $0xe8] sm:$0xff] %vm944_vm2, %v941_v57  ;;  %v909_v63 = vadd.f32 %v2193_v60, %v2725_v1  ;;  %v903_v0 = vpop.f32.mrb[31].mxu0  ;;  %v996_v19 = vld [vmem:[#allocation2 + $0xc0] sm:$0xff] }
 0x148   : > { %1210 = vrot.lane.b32.xlu0 %v1034_v61, %s2456_s14  ;;  %1056 = vrot.lane.b32.xlu1 %v993_v62, %s2459_s22  ;;  %973 = vst.msk [vmem:[#allocation2 + $0xe0] sm:$0xff] %vm944_vm2, %v940_v59  ;;  %v904_v2 = vadd.f32 %v2725_v1, %v903_v0  ;;  %v1289_v1 = vld [vmem:[%s3201_s3 + $0x40] sm:$0xff]  ;;  %v978_v0 = vld [vmem:[#allocation2 + $0x8] sm:$0xff] }
 0x149   : > { %v943_v5 = vmax.f32 %v909_v63, 0.0  ;;  %v2278_v12 = vpack.c.bf16 %v1290_v10, %v1289_v1  ;;  %v1020_v25 = vld [vmem:[#allocation2 + $0xc1] sm:$0xff] }
 0x14a   : > { %v942_v7 = vmax.f32 %v904_v2, 0.0 }
 0x14b   : > { %976 = vst.msk [vmem:[#allocation2 + $0xf8] sm:$0xff] %vm944_vm2, %v943_v5  ;;  %2279 = vmatprep.subr.bf16.mxu1 %v2278_v12  ;;  %v1021_v21 = vld [vmem:[#allocation2 + $0xc9] sm:$0xff]  ;;  %v1022_v26 = vld [vmem:[#allocation2 + $0xd1] sm:$0xff] }
 0x14c   : > { %1212 = vrot.lane.b32.xlu0 %v1035_v8, %s2456_s14  ;;  %1152 = vrot.lane.b32.xlu1 %v1017_v9, %s2458_s16  ;;  %975 = vst.msk [vmem:[#allocation2 + $0xf0] sm:$0xff] %vm944_vm2, %v942_v7  ;;  %v998_v23 = vld [vmem:[#allocation2 + $0xd0] sm:$0xff]  ;;  %v980_v8 = vld [vmem:[#allocation2 + $0x20] sm:$0xff] }
 0x14d   : > { %2281 = vmatpush3.bf16.msra.mxu1 %v2278_v12  ;;  %v979_v9 = vld [vmem:[#allocation2 + $0x10] sm:$0xff] }
 0x14e   : > { %v1000_v24 = vld [vmem:[#allocation2 + $0xe8] sm:$0xff] }
 0x14f   : > { %v999_v27 = vld [vmem:[#allocation2 + $0xe0] sm:$0xff] }
 0x150   : > { %1118 = vrot.lane.b32.xlu0 %v1012_v13, %s3211_s15  ;;  %1060 = vrot.lane.b32.xlu1 %v995_v11, %s2459_s22  ;;  %v1023_v29 = vld [vmem:[#allocation2 + $0xe1] sm:$0xff] }
 0x153   : > { %v1024_v28 = vld [vmem:[#allocation2 + $0xe9] sm:$0xff]  ;;  %v1025_v32 = vld [vmem:[#allocation2 + $0xf1] sm:$0xff] }
 0x154   : > { %1052 = vrot.lane.b32.xlu0 %v991_v14, %s2459_s22  ;;  %1156 = vrot.lane.b32.xlu1 %v1019_v15, %s2458_s16  ;;  %v1001_v30 = vld [vmem:[#allocation2 + $0xf0] sm:$0xff] }
 0x158   : > { %1050 = vrot.lane.b32.xlu0 %v990_v17, %s2459_s22  ;;  %1064 = vrot.lane.b32.xlu1 %v997_v16, %s2459_s22 }
 0x15c   : > { %1146 = vrot.lane.b32.xlu0 %v1014_v18, %s2458_s16  ;;  %1062 = vrot.lane.b32.xlu1 %v996_v19, %s2459_s22  ;;  %v982_v18 = vld [vmem:[#allocation2 + $0x30] sm:$0xff] }
 0x160   : > { %1150 = vrot.lane.b32.xlu0 %v1016_v20, %s2458_s16  ;;  %1160 = vrot.lane.b32.xlu1 %v1021_v21, %s2458_s16  ;;  %v981_v20 = vld [vmem:[#allocation2 + $0x28] sm:$0xff] }
 0x164   : > { %1154 = vrot.lane.b32.xlu0 %v1018_v22, %s2458_s16  ;;  %1066 = vrot.lane.b32.xlu1 %v998_v23, %s2459_s22 }
 0x168   : > { %1158 = vrot.lane.b32.xlu0 %v1020_v25, %s2458_s16  ;;  %1070 = vrot.lane.b32.xlu1 %v1000_v24, %s2459_s22 }
 0x16c   : > { %1162 = vrot.lane.b32.xlu0 %v1022_v26, %s2458_s16  ;;  %1068 = vrot.lane.b32.xlu1 %v999_v27, %s2459_s22 }
 0x170   : > { %1166 = vrot.lane.b32.xlu0 %v1024_v28, %s2458_s16  ;;  %1164 = vrot.lane.b32.xlu1 %v1023_v29, %s2458_s16 }
 0x174   : > { %1214 = vrot.lane.b32.xlu0 %v1036_v31, %s2456_s14  ;;  %1072 = vrot.lane.b32.xlu1 %v1001_v30, %s2459_s22  ;;  %v984_v30 = vld [vmem:[#allocation2 + $0x48] sm:$0xff] }
 0x178   : > { %1168 = vrot.lane.b32.xlu1 %v1025_v32, %s2458_s16 }
 0x17c   : > { %1216 = vrot.lane.b32.xlu1 %v1037_v33, %s2456_s14 }
 0x18a   : > { %v1195_v34 = vpop.permute.xlu0 %1194 }
 0x18b   : > { %v1099_v35 = vpop.permute.xlu1 %1098 }
 0x18e   : > { %v1197_v36 = vpop.permute.xlu0 %1196 }
 0x18f   : > { %v1101_v37 = vpop.permute.xlu1 %1100 }
 0x192   : > { %v1103_v38 = vpop.permute.xlu0 %1102 }
 0x193   : > { %v1105_v39 = vpop.permute.xlu1 %1104 }
 0x196   : > { %v1199_v40 = vpop.permute.xlu0 %1198 }
 0x197   : > { %v1109_v41 = vpop.permute.xlu1 %1108 }
 0x19a   : > { %v1201_v42 = vpop.permute.xlu0 %1200 }
 0x19e   : > { %v2869_v43 = vpop.permute.xlu0 %1106  ;;  %v2871_v44 = vpop.permute.xlu1 %1112 }
 0x1a2   : > { %v2873_v45 = vpop.permute.xlu0 %1202  ;;  %v2875_v46 = vpop.permute.xlu1 %1116 }
 0x1a6   : > { %v2877_v47 = vpop.permute.xlu0 %1204  ;;  %v2879_v48 = vpop.permute.xlu1 %1120 }
 0x1aa   : > { %v2881_v49 = vpop.permute.xlu0 %1110 }
 0x1ae   : > { %v2883_v50 = vpop.permute.xlu0 %1206  ;;  %v1149_v51 = vpop.permute.xlu1 %1148 }
 0x1b2   : > { %v2885_v52 = vpop.permute.xlu0 %1208  ;;  %v1055_v53 = vpop.permute.xlu1 %1054 }
 0x1b3   : > { %v1232_v14 = vsel %vm944_vm2, %v979_v9, %v1055_v53 }
 0x1b4   : > { %v1245_v24 = vsel %vm1242_vm3, %v1232_v14, %v1103_v38 }
 0x1b6   : > { %v2887_v54 = vpop.permute.xlu0 %1114  ;;  %v1059_v55 = vpop.permute.xlu1 %1058 }
 0x1b7   : > { %v1234_v26 = vsel %vm944_vm2, %v981_v20, %v1059_v55 }
 0x1ba   : > { %v2889_v56 = vpop.permute.xlu0 %1210  ;;  %v1057_v57 = vpop.permute.xlu1 %1056 }
 0x1bb   : > { %v1233_v1 = vsel %vm944_vm2, %v980_v8, %v1057_v57 }
 0x1bc   : > { %v1246_v17 = vsel %vm1242_vm3, %v1233_v1, %v1105_v39 }
 0x1be   : > { %v2891_v58 = vpop.permute.xlu0 %1212  ;;  %v1153_v59 = vpop.permute.xlu1 %1152 }
 0x1bf   : > { %v1259_v21 = vsel %vm1255_vm4, %v1246_v17, %v1153_v59  ;;  %v1586_v17 = vld [vmem:[%s3203_s5 + $0x10] sm:$0xff] }
 0x1c0   : > { %v1272_v31 = vsel %vm1268_vm6, %v1259_v21, %v1201_v42  ;;  %v1588_v21 = vld [vmem:[%s3203_s5 + $0x20] sm:$0xff] }
 0x1c2   : > { %v2893_v60 = vpop.permute.xlu0 %1118  ;;  %v1061_v61 = vpop.permute.xlu1 %1060 }
 0x1c3   : > { %v1235_v22 = vsel %vm944_vm2, %v982_v18, %v1061_v61 }
 0x1c4   : > { %v1248_v29 = vsel %vm1242_vm3, %v1235_v22, %v1109_v41  ;;  %v1589_v22 = vld [vmem:[%s3203_s5 + $0x28] sm:$0xff] }
 0x1c6   : > { %v1053_v62 = vpop.permute.xlu0 %1052  ;;  %v1157_v63 = vpop.permute.xlu1 %1156 }
 0x1c7   : > { %v1231_v2 = vsel %vm944_vm2, %v978_v0, %v1053_v62  ;;  %v1261_v32 = vsel %vm1255_vm4, %v1248_v29, %v1157_v63 }
 0x1c8   : > { %v1244_v6 = vsel %vm1242_vm3, %v1231_v2, %v1101_v37  ;;  %v1274_v42 = vsel %vm1268_vm6, %v1261_v32, %v2877_v47 }
 0x1c9   : > { %v1257_v13 = vsel %vm1255_vm4, %v1244_v6, %v1149_v51  ;;  %v985_v51 = vld [vmem:[#allocation2 + $0x50] sm:$0xff] }
 0x1ca   : > { %v1051_v3 = vpop.permute.xlu0 %1050  ;;  %v1065_v5 = vpop.permute.xlu1 %1064  ;;  %v1270_v19 = vsel %vm1268_vm6, %v1257_v13, %v1197_v36  ;;  %v1247_v36 = vsel %vm1242_vm3, %v1234_v26, %v2869_v43 }
 0x1cb   : > { %v1230_v7 = vsel %vm944_vm2, %v977_v4, %v1051_v3  ;;  %v1237_v33 = vsel %vm944_vm2, %v984_v30, %v1065_v5  ;;  %v987_v3 = vld [vmem:[#allocation2 + $0x68] sm:$0xff]  ;;  %v1594_v30 = vld [vmem:[%s3203_s5 + $0x50] sm:$0xff] }
 0x1cc   : > { %v1243_v11 = vsel %vm1242_vm3, %v1230_v7, %v1099_v35  ;;  %v1250_v41 = vsel %vm1242_vm3, %v1237_v33, %v2871_v44  ;;  %v1596_v33 = vld [vmem:[%s3203_s5 + $0x60] sm:$0xff] }
 0x1ce   : > { %v1147_v10 = vpop.permute.xlu0 %1146  ;;  %v1063_v12 = vpop.permute.xlu1 %1062 }
 0x1cf   : > { %v1256_v15 = vsel %vm1255_vm4, %v1243_v11, %v1147_v10 }
 0x1d0   : > { %v1269_v16 = vsel %vm1268_vm6, %v1256_v15, %v1195_v34  ;;  %v983_v34 = vld [vmem:[#allocation2 + $0x40] sm:$0xff] }
 0x1d1   : > { %2214 = vmatprep.mubr.msk.f32.mxu1 %vm1298_vm5, %v1269_v16  ;;  %v1236_v38 = vsel %vm944_vm2, %v983_v34, %v1063_v12  ;;  %v1584_v15 = vld [vmem:[%s3203_s5] sm:$0xff]  ;;  %v1585_v16 = vld [vmem:[%s3203_s5 + $0x8] sm:$0xff] }
 0x1d2   : > { %v1151_v23 = vpop.permute.xlu0 %1150  ;;  %v1161_v25 = vpop.permute.xlu1 %1160  ;;  %2215 = vmatmul.mubr.msk.f32.vlgmr.msra.gmra.mrb[0].mxu1 %vm1298_vm5, %v1270_v19  ;;  %v1249_v55 = vsel %vm1242_vm3, %v1236_v38, %v2881_v49  ;;  %v986_v49 = vld [vmem:[#allocation2 + $0x60] sm:$0xff]  ;;  %v2283_v18 = vpack.c.bf16 %v1585_v16, %v1584_v15  ;;  %v1587_v19 = vld [vmem:[%s3203_s5 + $0x18] sm:$0xff]  ;;  %v1597_v34 = vld [vmem:[%s3203_s5 + $0x68] sm:$0xff] }
 0x1d3   : > { %v1258_v27 = vsel %vm1255_vm4, %v1245_v24, %v1151_v23  ;;  %v1263_v43 = vsel %vm1255_vm4, %v1250_v41, %v1161_v25  ;;  %v2286_v20 = vpack.c.bf16 %v1587_v19, %v1586_v17  ;;  %v2289_v23 = vpack.c.bf16 %v1589_v22, %v1588_v21  ;;  %v1590_v24 = vld [vmem:[%s3203_s5 + $0x30] sm:$0xff]  ;;  %v1591_v25 = vld [vmem:[%s3203_s5 + $0x38] sm:$0xff] }
 0x1d4   : > { %v1271_v28 = vsel %vm1268_vm6, %v1258_v27, %v1199_v40  ;;  %v1276_v47 = vsel %vm1268_vm6, %v1263_v43, %v2885_v52  ;;  %v2292_v26 = vpack.c.bf16 %v1591_v25, %v1590_v24  ;;  %v1592_v27 = vld [vmem:[%s3203_s5 + $0x40] sm:$0xff] }
 0x1d5   : > { %2217 = vmatprep.mubr.msk.f32.mxu1 %vm1298_vm5, %v1271_v28  ;;  %v1593_v28 = vld [vmem:[%s3203_s5 + $0x48] sm:$0xff] }
 0x1d6   : > { %v1155_v35 = vpop.permute.xlu0 %1154  ;;  %v1067_v37 = vpop.permute.xlu1 %1066  ;;  %2218 = vmatmul.mubr.msk.f32.gmra.mrb[2].mxu1 %vm1298_vm5, %v1272_v31  ;;  %v2295_v29 = vpack.c.bf16 %v1593_v28, %v1592_v27  ;;  %v1595_v31 = vld [vmem:[%s3203_s5 + $0x58] sm:$0xff] }
 0x1d7   : > { %v1260_v39 = vsel %vm1255_vm4, %v1247_v36, %v1155_v35  ;;  %v2298_v32 = vpack.c.bf16 %v1595_v31, %v1594_v30  ;;  %v2301_v35 = vpack.c.bf16 %v1597_v34, %v1596_v33  ;;  %v1598_v36 = vld [vmem:[%s3203_s5 + $0x70] sm:$0xff]  ;;  %v1742_v33 = vld [vmem:[%s3205_s7 + $0x8] sm:$0xff] }
 0x1d8   : > { %v1273_v40 = vsel %vm1268_vm6, %v1260_v39, %v2873_v45  ;;  %v1238_v45 = vsel %vm944_vm2, %v985_v51, %v1067_v37  ;;  %v1599_v37 = vld [vmem:[%s3203_s5 + $0x78] sm:$0xff]  ;;  %v3029_v39 = vld [vmem:[%s3202_s4] ss:$0 sm:$0xff]  ;;  %v1743_v34 = vld [vmem:[%s3205_s7 + $0x10] sm:$0xff] }
 0x1d9   : > { %2220 = vmatprep.mubr.msk.f32.mxu1 %vm1298_vm5, %v1273_v40  ;;  %v1251_v62 = vsel %vm1242_vm3, %v1238_v45, %v2887_v54  ;;  %v2304_v38 = vpack.c.bf16 %v1599_v37, %v1598_v36  ;;  %v1744_v36 = vld [vmem:[%s3205_s7 + $0x18] sm:$0xff] }
 0x1da   : > { %v1159_v53 = vpop.permute.xlu0 %1158  ;;  %v1071_v57 = vpop.permute.xlu1 %1070  ;;  %2221 = vmatmul.mubr.msk.f32.gmra.mrb[4].mxu1 %vm1298_vm5, %v1274_v42  ;;  %v2316_v37 = vpack.c.bf16 %v1744_v36, %v1743_v34 }
 0x1db   : > { %v1262_v59 = vsel %vm1255_vm4, %v1249_v55, %v1159_v53  ;;  %v1240_v52 = vsel %vm944_vm2, %v987_v3, %v1071_v57 }
 0x1dc   : > { %v1275_v44 = vsel %vm1268_vm6, %v1262_v59, %v2883_v50  ;;  %v1253_v8 = vsel %vm1242_vm3, %v1240_v52, %v2893_v60 }
 0x1dd   : > { %2223 = vmatprep.mubr.msk.f32.mxu1 %vm1298_vm5, %v1275_v44 }
 0x1de   : > { %v1163_v61 = vpop.permute.xlu0 %1162  ;;  %v1069_v63 = vpop.permute.xlu1 %1068  ;;  %2224 = vmatmul.mubr.msk.f32.gmra.mrb[6].mxu1 %vm1298_vm5, %v1276_v47 }
 0x1df   : > { %v1264_v0 = vsel %vm1255_vm4, %v1251_v62, %v1163_v61  ;;  %v1239_v2 = vsel %vm944_vm2, %v986_v49, %v1069_v63  ;;  %v1600_v63 = vld [vmem:[%s3203_s5 + $0x80] sm:$0xff] }
 0x1e0   : > { %v1277_v50 = vsel %vm1268_vm6, %v1264_v0, %v2889_v56  ;;  %v1252_v54 = vsel %vm1242_vm3, %v1239_v2, %v2875_v46  ;;  %v988_v46 = vld [vmem:[#allocation2 + $0x70] sm:$0xff]  ;;  %v1601_v0 = vld [vmem:[%s3203_s5 + $0x88] sm:$0xff] }
 0x1e1   : > { %2226 = vmatprep.mubr.msk.f32.mxu1 %vm1298_vm5, %v1277_v50  ;;  %v2307_v50 = vpack.c.bf16 %v1601_v0, %v1600_v63 }
 0x1e2   : > { %v1167_v4 = vpop.permute.xlu0 %1166  ;;  %v1165_v5 = vpop.permute.xlu1 %1164 }
 0x1e3   : > { %v1265_v6 = vsel %vm1255_vm4, %v1252_v54, %v1165_v5  ;;  %v1266_v56 = vsel %vm1255_vm4, %v1253_v8, %v1167_v4  ;;  %v1603_v8 = vld [vmem:[%s3203_s5 + $0x98] sm:$0xff] }
 0x1e4   : > { %v1278_v7 = vsel %vm1268_vm6, %v1265_v6, %v2891_v58  ;;  %v1602_v6 = vld [vmem:[%s3203_s5 + $0x90] sm:$0xff] }
 0x1e5   : > { %2227 = vmatmul.mubr.msk.f32.gmra.mrb[8].mxu1 %vm1298_vm5, %v1278_v7 }
 0x1e6   : > { %v1215_v9 = vpop.permute.xlu0 %1214  ;;  %v1073_v1 = vpop.permute.xlu1 %1072 }
 0x1e7   : > { %v1279_v10 = vsel %vm1268_vm6, %v1266_v56, %v1215_v9  ;;  %v1241_v11 = vsel %vm944_vm2, %v988_v46, %v1073_v1  ;;  %v2310_v9 = vpack.c.bf16 %v1603_v8, %v1602_v6 }
 0x1e8   : > { %2229 = vmatprep.mubr.msk.f32.mxu1 %vm1298_vm5, %v1279_v10  ;;  %v1254_v58 = vsel %vm1242_vm3, %v1241_v11, %v2879_v48  ;;  %v2460_v48 = vmov 0.0|0.0  }
 0x1e9   : > { %2282 = vmatprep.subr.bf16.mxu1 %v2460_v48  ;;  %2312 = vmatprep.subr.bf16.mxu0 %v2460_v48 }
 0x1ea   : > { %v1169_v12 = vpop.permute.xlu1 %1168  ;;  %2284 = vmatpush1.bf16.msra.mxu1 %v2283_v18 }
 0x1eb   : > { %v1267_v13 = vsel %vm1255_vm4, %v1254_v58, %v1169_v12  ;;  %2285 = vmatprep.subr.bf16.mxu1 %v2460_v48 }
 0x1ee   : > { %v1217_v60 = vpop.permute.xlu1 %1216  ;;  %2287 = vmatpush1.bf16.msra.mxu1 %v2286_v20 }
 0x1ef   : > { %v1280_v14 = vsel %vm1268_vm6, %v1267_v13, %v1217_v60  ;;  %2288 = vmatprep.subr.bf16.mxu1 %v2460_v48 }
 0x1f0   : > { %2230 = vmatmul.mubr.msk.f32.gmra.mrb[10].mxu1 %vm1298_vm5, %v1280_v14 }
 0x1f2   : > { %2290 = vmatpush1.bf16.msra.mxu1 %v2289_v23 }
 0x1f3   : > { %2291 = vmatprep.subr.bf16.mxu1 %v2460_v48 }
 0x1f6   : > { %2293 = vmatpush1.bf16.msra.mxu1 %v2292_v26 }
 0x1f7   : > { %2294 = vmatprep.subr.bf16.mxu1 %v2460_v48 }
 0x1fa   : > { %2296 = vmatpush1.bf16.msra.mxu1 %v2295_v29 }
 0x1fb   : > { %2297 = vmatprep.subr.bf16.mxu1 %v2460_v48 }
 0x1fe   : > { %2299 = vmatpush1.bf16.msra.mxu1 %v2298_v32  ;;  %v1741_v32 = vld [vmem:[%s3205_s7] sm:$0xff] }
 0x1ff   : > { %2300 = vmatprep.subr.bf16.mxu1 %v2460_v48 }
 0x202   : > { %2302 = vmatpush1.bf16.msra.mxu1 %v2301_v35  ;;  %v2313_v35 = vpack.c.bf16 %v1742_v33, %v1741_v32 }
 0x203   : > { %2303 = vmatprep.subr.bf16.mxu1 %v2460_v48 }
 0x204   : > { %2314 = vmatpush3.bf16.msra.mxu0 %v2313_v35 }
 0x205   : > { %2315 = vmatprep.subr.bf16.mxu0 %v2460_v48 }
 0x206   : > { %2305 = vmatpush1.bf16.msra.mxu1 %v2304_v38 }
 0x207   : > { %2306 = vmatprep.subr.bf16.mxu1 %v2460_v48 }
 0x208   : > { %2317 = vmatpush3.bf16.msra.mxu0 %v2316_v37 }
 0x209   : > { %2318 = vmatprep.subr.bf16.mxu0 %v2460_v48 }
 0x20a   : > { %2308 = vmatpush1.bf16.msra.mxu1 %v2307_v50 }
 0x20b   : > { %2309 = vmatprep.subr.bf16.mxu1 %v2460_v48 }
 0x20e   : > { %2311 = vmatpush1.bf16.msra.mxu1 %v2310_v9 }
 0x2a5   : > { %v2216_v40 = vpop.f32.mrb[0].mxu1 }
 0x2a6   : > { %v1407_v41 = vadd.f32 %v2216_v40, %v3029_v39  ;;  %v1401_v42 = vpop.f32.mrb[1].mxu1 }
 0x2a7   : > { %v1402_v43 = vadd.f32 %v3029_v39, %v1401_v42 }
 0x2a8   : > { %v1461_v51 = vmax.f32 %v1407_v41, 0.0 }
 0x2a9   : > { %v1460_v53 = vmax.f32 %v1402_v43, 0.0  ;;  %v2219_v55 = vpop.f32.mrb[2].mxu1 }
 0x2aa   : > { %1473 = vst.msk [vmem:[#allocation3 + $0x8] sm:$0xff] %vm1242_vm3, %v1461_v51  ;;  %v1417_v57 = vadd.f32 %v2219_v55, %v3029_v39  ;;  %v1411_v45 = vpop.f32.mrb[3].mxu1 }
 0x2ab   : > { %1472 = vst.msk [vmem:[#allocation3] sm:$0xff] %vm1242_vm3, %v1460_v53  ;;  %v1412_v59 = vadd.f32 %v3029_v39, %v1411_v45 }
 0x2ac   : > { %v1463_v44 = vmax.f32 %v1417_v57, 0.0 }
 0x2ad   : > { %v1462_v47 = vmax.f32 %v1412_v59, 0.0  ;;  %v2222_v61 = vpop.f32.mrb[4].mxu1 }
 0x2ae   : > { %1475 = vst.msk [vmem:[#allocation3 + $0x18] sm:$0xff] %vm1242_vm3, %v1463_v44  ;;  %v1427_v62 = vadd.f32 %v2222_v61, %v3029_v39  ;;  %v1421_v49 = vpop.f32.mrb[5].mxu1 }
 0x2af   : > { %1474 = vst.msk [vmem:[#allocation3 + $0x10] sm:$0xff] %vm1242_vm3, %v1462_v47  ;;  %v1422_v2 = vadd.f32 %v3029_v39, %v1421_v49 }
 0x2b0   : > { %v1465_v3 = vmax.f32 %v1427_v62, 0.0 }
 0x2b1   : > { %v1464_v52 = vmax.f32 %v1422_v2, 0.0  ;;  %v2225_v4 = vpop.f32.mrb[6].mxu1 }
 0x2b2   : > { %1477 = vst.msk [vmem:[#allocation3 + $0x28] sm:$0xff] %vm1242_vm3, %v1465_v3  ;;  %v1437_v54 = vadd.f32 %v2225_v4, %v3029_v39  ;;  %v1431_v5 = vpop.f32.mrb[7].mxu1  ;;  %v1492_v58 = vld [vmem:[#allocation3 + $0x1] ss:$2 sm:$0xff]  ;;  %v1484_v53 = vld [vmem:[#allocation3] ss:$2 sm:$0xff] }
 0x2b3   : > { %1476 = vst.msk [vmem:[#allocation3 + $0x20] sm:$0xff] %vm1242_vm3, %v1464_v52  ;;  %v1432_v7 = vadd.f32 %v3029_v39, %v1431_v5 }
 0x2b4   : > { %v1467_v56 = vmax.f32 %v1437_v54, 0.0 }
 0x2b5   : > { %v1466_v1 = vmax.f32 %v1432_v7, 0.0 }
 0x2b6   : > { %1479 = vst.msk [vmem:[#allocation3 + $0x38] sm:$0xff] %vm1242_vm3, %v1467_v56  ;;  %v1516_v10 = vld [vmem:[#allocation3 + $0x4] ss:$2 sm:$0xff]  ;;  %v1508_v21 = vld [vmem:[#allocation3 + $0x3] ss:$2 sm:$0xff] }
 0x2b7   : > { %1478 = vst.msk [vmem:[#allocation3 + $0x30] sm:$0xff] %vm1242_vm3, %v1466_v1  ;;  %2061 = vmatprep.mubr.msk.f32.mxu1 %vm1242_vm3, %v1516_v10  ;;  %v1500_v60 = vld [vmem:[#allocation3 + $0x2] ss:$2 sm:$0xff] }
 0x2b8   : > { %v2228_v46 = vpop.f32.mrb[8].mxu1 }
 0x2b9   : > { %v1447_v11 = vadd.f32 %v2228_v46, %v3029_v39  ;;  %v1441_v12 = vpop.f32.mrb[9].mxu1 }
 0x2ba   : > { %v1442_v13 = vadd.f32 %v3029_v39, %v1441_v12  ;;  %v1502_v14 = vld [vmem:[#allocation3 + $0x1a] ss:$2 sm:$0xff]  ;;  %v1494_v15 = vld [vmem:[#allocation3 + $0x19] ss:$2 sm:$0xff] }
 0x2bb   : > { %v1469_v16 = vmax.f32 %v1447_v11, 0.0  ;;  %v2382_v17 = vpack.i.bf16 %v1502_v14, %v1500_v60  ;;  %v2377_v18 = vpack.i.bf16 %v1494_v15, %v1492_v58  ;;  %v1510_v20 = vld [vmem:[#allocation3 + $0x1b] ss:$2 sm:$0xff]  ;;  %v1486_v62 = vld [vmem:[#allocation3 + $0x18] ss:$2 sm:$0xff]  ;;  %v1747_v15 = vld [vmem:[%s3205_s7 + $0x30] sm:$0xff] }
 0x2bc   : > { %v1468_v19 = vmax.f32 %v1442_v13, 0.0  ;;  %v2387_v22 = vpack.i.bf16 %v1510_v20, %v1508_v21  ;;  %v1518_v2 = vld [vmem:[#allocation3 + $0x1c] ss:$2 sm:$0xff] }
 0x2bd   : > { %1481 = vst.msk [vmem:[#allocation3 + $0x48] sm:$0xff] %vm1242_vm3, %v1469_v16  ;;  %2383 = vrot.lane.b32.xlu1 %v2382_v17, %s2456_s14  ;;  %2378 = vrot.lane.b32.xlu0 %v2377_v18, %s3211_s15  ;;  %v1745_v13 = vld [vmem:[%s3205_s7 + $0x20] sm:$0xff]  ;;  %v1746_v60 = vld [vmem:[%s3205_s7 + $0x28] sm:$0xff]  ;;  %v2463_v18 = vmov 0.0  }
 0x2be   : > { %1480 = vst.msk [vmem:[#allocation3 + $0x40] sm:$0xff] %vm1242_vm3, %v1468_v19  ;;  %v1496_v23 = vld [vmem:[#allocation3 + $0x31] ss:$2 sm:$0xff]  ;;  %v1488_v3 = vld [vmem:[#allocation3 + $0x30] ss:$2 sm:$0xff]  ;;  %v2319_v14 = vpack.c.bf16 %v1746_v60, %v1745_v13  ;;  %2248 = vmatprep.mubr.msk.f32.mxu0 %vm2462_vm8, %v2463_v18 }
 0x2bf   : > { %v1748_v16 = vld [vmem:[%s3205_s7 + $0x38] sm:$0xff]  ;;  %v2060_v19 = vld [vmem:[%s3204_s6] ss:$0 sm:$0xff] }
 0x2c0   : > { %2320 = vmatpush3.bf16.msra.mxu0 %v2319_v14  ;;  %v2322_v17 = vpack.c.bf16 %v1748_v16, %v1747_v15 }
 0x2c1   : > { %1531 = vrot.lane.b32.xlu1 %v1496_v23, %s3211_s15  ;;  %2388 = vrot.lane.b32.xlu0 %v2387_v22, %s2461_s13  ;;  %s1925_s15 = scalar_lea.sflag [#allocation6], %s2653_s25 }
 0x2c2   : > { %2321 = vmatprep.subr.bf16.mxu0 %v2460_v48 }
 0x2c3   : > { %v2231_v24 = vpop.f32.mrb[10].mxu1 }
 0x2c4   : > { %v1457_v25 = vadd.f32 %v2231_v24, %v3029_v39  ;;  %v1451_v26 = vpop.f32.mrb[11].mxu1  ;;  %2323 = vmatpush3.bf16.msra.mxu0 %v2322_v17 }
 0x2c5   : > { %v1452_v27 = vadd.f32 %v3029_v39, %v1451_v26  ;;  %v1512_v28 = vld [vmem:[#allocation3 + $0x33] ss:$2 sm:$0xff]  ;;  %v1504_v29 = vld [vmem:[#allocation3 + $0x32] ss:$2 sm:$0xff]  ;;  %2324 = vmatprep.subr.bf16.mxu0 %v2460_v48 }
 0x2c6   : > { %v1471_v30 = vmax.f32 %v1457_v25, 0.0  ;;  %1563 = vrot.lane.b32.xlu1 %v1512_v28, %s2461_s13  ;;  %1547 = vrot.lane.b32.xlu0 %v1504_v29, %s2456_s14  ;;  %v1520_v7 = vld [vmem:[#allocation3 + $0x34] ss:$2 sm:$0xff] }
 0x2c7   : > { %v1470_v31 = vmax.f32 %v1452_v27, 0.0 }
 0x2c8   : > { %1483 = vst.msk [vmem:[#allocation3 + $0x58] sm:$0xff] %vm1242_vm3, %v1471_v30 }
 0x2c9   : > { %1482 = vst.msk [vmem:[#allocation3 + $0x50] sm:$0xff] %vm1242_vm3, %v1470_v31 }
 0x2d0   : > { %v1506_v38 = vld [vmem:[#allocation3 + $0x4a] ss:$2 sm:$0xff]  ;;  %v1498_v39 = vld [vmem:[#allocation3 + $0x49] ss:$2 sm:$0xff] }
 0x2d1   : > { %1549 = vrot.lane.b32.xlu1 %v1506_v38, %s2456_s14  ;;  %1533 = vrot.lane.b32.xlu0 %v1498_v39, %s3216_s24  ;;  %v1514_v40 = vld [vmem:[#allocation3 + $0x4b] ss:$2 sm:$0xff]  ;;  %v1522_v56 = vld [vmem:[#allocation3 + $0x4c] ss:$2 sm:$0xff]  ;;  %s2012_s14 = sshll.u32 %s2653_s25, 2  ;;  %s3154_s24 = scalar_lea.hbm %s3209_s11, %s2070_s29 }
 0x2d2   : > { %v1490_v9 = vld [vmem:[#allocation3 + $0x48] ss:$2 sm:$0xff]  ;;  %s544_s30 = scalar_lea.vmem [#allocation5], %s2012_s14  ;;  %s2464_s14 = smov [#allocation5]  }
 0x2d3   : > { %s1938_s12 = sshll.u32 %s544_s30, 4  ;;  %s2396_s21 = sshll.u32 %s2464_s14, 4  ;;  %s3156_s12 = int_to_ptr.vmem [resolvable:$true] %s1938_s12  ;;  %s2397_s21 = int_to_ptr.vmem [resolvable:$false] %s2396_s21 }
 0x2d4   : > { %s2398_s0 = scalar_lea.vmem %s2397_s21, 128  ;;  %p2399_p2 = scmp.lt.s32.totalorder %s3156_s12, %s2397_s21 }
 0x2d5   : > { %1565 = vrot.lane.b32.xlu0 %v1514_v40, %s2461_s13  ;;  %s2392_s13 = scalar_lea.vmem %s3156_s12, 64 }
 0x2d6   : > { %p2393_p13 = scmp.ne.s32.totalorder %s3156_s12, %s2392_s13  ;;  %p2400_p3 = scmp.lt.s32.totalorder %s2398_s0, %s2392_s13 }
 0x2d8   : > { %p2394_p0 = pnand %p2393_p13, %p2563_p6  ;;  %p2401_p4 = por %p2400_p3, %p2399_p2 }
 0x2da   : > { %p2395_p1 = pneg %p2394_p0 }
 0x2dc   : > { %p2402_p5 = pnand %p2401_p4, %p2395_p1 }
 0x32f   : > { %v2384_v41 = vpop.permute.xlu1 %2383  ;;  %v2379_v42 = vpop.permute.xlu0 %2378 }
 0x330   : > { %v2380_v43 = vunpack.i.l.bf16 %v2379_v42  ;;  %v2385_v51 = vunpack.i.l.bf16 %v2384_v41  ;;  %v2381_v55 = vunpack.i.h.bf16 %v2379_v42  ;;  %v2386_v44 = vunpack.i.h.bf16 %v2384_v41 }
 0x332   : > { %v1571_v57 = vsel %vm1242_vm3, %v1484_v53, %v2380_v43  ;;  %v1572_v0 = vsel %vm1242_vm3, %v1486_v62, %v2381_v55 }
 0x333   : > { %v2389_v45 = vpop.permute.xlu0 %2388  ;;  %v1532_v47 = vpop.permute.xlu1 %1531  ;;  %v1575_v61 = vsel %vm1268_vm6, %v1571_v57, %v2385_v51  ;;  %v1576_v52 = vsel %vm1268_vm6, %v1572_v0, %v2386_v44 }
 0x334   : > { %v2390_v59 = vunpack.i.l.bf16 %v2389_v45  ;;  %v2391_v49 = vunpack.i.h.bf16 %v2389_v45  ;;  %v1573_v4 = vsel %vm1242_vm3, %v1488_v3, %v1532_v47 }
 0x336   : > { %v1580_v63 = vsel %vm1579_vm7, %v1575_v61, %v2390_v59  ;;  %v1581_v54 = vsel %vm1579_vm7, %v1576_v52, %v2391_v49 }
 0x337   : > { %1688 = vmatmul.mubr.f32.vlgmr.msra.gmra.mrb[12].mxu1 %v1580_v63 }
 0x338   : > { %v1548_v50 = vpop.permute.xlu0 %1547  ;;  %2062 = vmatprep.mubr.msk.f32.mxu1 %vm1242_vm3, %v1518_v2  ;;  %v1564_v5 = vpop.permute.xlu1 %1563 }
 0x339   : > { %v1577_v6 = vsel %vm1268_vm6, %v1573_v4, %v1548_v50 }
 0x33a   : > { %v1582_v8 = vsel %vm1579_vm7, %v1577_v6, %v1564_v5  ;;  %v1839_v6 = vld [vmem:[%s3207_s9] sm:$0xff] }
 0x33b   : > { %1693 = vmatmul.mubr.f32.gmra.mrb[14].mxu1 %v1581_v54 }
 0x33c   : > { %2063 = vmatprep.mubr.msk.f32.mxu1 %vm1242_vm3, %v1520_v7  ;;  %v1840_v7 = vld [vmem:[%s3207_s9 + $0x8] sm:$0xff] }
 0x33f   : > { %1698 = vmatmul.mubr.f32.gmra.mrb[16].mxu1 %v1582_v8 }
 0x340   : > { %2064 = vmatprep.mubr.msk.f32.mxu1 %vm1242_vm3, %v1522_v56 }
 0x343   : > { %v1534_v1 = vpop.permute.xlu0 %1533  ;;  %v1550_v10 = vpop.permute.xlu1 %1549 }
 0x344   : > { %v1574_v46 = vsel %vm1242_vm3, %v1490_v9, %v1534_v1  ;;  %v2325_v9 = vpack.c.bf16 %v1840_v7, %v1839_v6 }
 0x345   : > { %v1578_v12 = vsel %vm1268_vm6, %v1574_v46, %v1550_v10  ;;  %v1841_v10 = vld [vmem:[%s3207_s9 + $0x10] sm:$0xff]  ;;  %v1842_v46 = vld [vmem:[%s3207_s9 + $0x18] sm:$0xff] }
 0x347   : > { %v1566_v11 = vpop.permute.xlu0 %1565 }
 0x348   : > { %v1583_v58 = vsel %vm1579_vm7, %v1578_v12, %v1566_v11  ;;  %v2328_v11 = vpack.c.bf16 %v1842_v46, %v1841_v10  ;;  %v2065_v12 = vld [vmem:[%s3206_s8] ss:$0 sm:$0xff] }
 0x349   : > { %1703 = vmatmul.mubr.f32.gmra.mrb[18].mxu1 %v1583_v58 }
 0x40a   : > { %v1689_v20 = vpop.f32.mrb[12].mxu1 }
 0x40b   : > { %v1690_v21 = vadd.f32 %v2060_v19, %v1689_v20  ;;  %v1691_v22 = vpop.f32.mrb[13].mxu1 }
 0x40d   : > { %v1708_v23 = vmax.f32 %v1690_v21, 0.0 }
 0x40e   : > { %v1694_v24 = vpop.f32.mrb[14].mxu1 }
 0x40f   : > { %v1713_v25 = vsel %vm1712_vm9, %v1708_v23, 0.0  ;;  %v1695_v26 = vadd.f32 %v2060_v19, %v1694_v24  ;;  %v1696_v27 = vpop.f32.mrb[15].mxu1 }
 0x410   : > { %v1714_v28 = vrot.slane %v1713_v25, 4 }
 0x411   : > { %v1709_v29 = vmax.f32 %v1695_v26, 0.0 }
 0x412   : > { %v1715_v30 = vadd.f32 %v1714_v28, %v1713_v25  ;;  %v1699_v31 = vpop.f32.mrb[16].mxu1 }
 0x413   : > { %v1720_v32 = vsel %vm1712_vm9, %v1709_v29, 0.0  ;;  %v1700_v33 = vadd.f32 %v2060_v19, %v1699_v31  ;;  %v1701_v34 = vpop.f32.mrb[17].mxu1 }
 0x414   : > { %v1716_v35 = vrot.slane %v1715_v30, 2  ;;  %v1721_v36 = vrot.slane %v1720_v32, 4 }
 0x415   : > { %v1710_v37 = vmax.f32 %v1700_v33, 0.0 }
 0x416   : > { %v1717_v38 = vadd.f32 %v1716_v35, %v1715_v30  ;;  %v1722_v39 = vadd.f32 %v1721_v36, %v1720_v32 }
 0x417   : > { %v1727_v40 = vsel %vm1712_vm9, %v1710_v37, 0.0 }
 0x418   : > { %v1723_v41 = vrot.slane %v1722_v39, 2  ;;  %v1728_v42 = vrot.slane %v1727_v40, 4  ;;  %v1718_v43 = vrot.slane %v1717_v38, 1 }
 0x41a   : > { %v1724_v51 = vadd.f32 %v1723_v41, %v1722_v39  ;;  %v1729_v53 = vadd.f32 %v1728_v42, %v1727_v40  ;;  %v1719_v47 = vadd.f32 %v1718_v43, %v1717_v38 }
 0x41c   : > { %v1725_v55 = vrot.slane %v1724_v51, 1  ;;  %v1730_v57 = vrot.slane %v1729_v53, 2  ;;  %v1704_v45 = vpop.f32.mrb[18].mxu1 }
 0x41d   : > { %v1705_v59 = vadd.f32 %v2060_v19, %v1704_v45  ;;  %v1706_v44 = vpop.f32.mrb[19].mxu1 }
 0x41e   : > { %v1726_v61 = vadd.f32 %v1725_v55, %v1724_v51  ;;  %v1731_v62 = vadd.f32 %v1730_v57, %v1729_v53 }
 0x41f   : > { %v1711_v49 = vmax.f32 %v1705_v59, 0.0 }
 0x420   : > { %v1761_v63 = vsel %vm1760_vm10, %v1726_v61, %v1719_v47  ;;  %v1732_v0 = vrot.slane %v1731_v62, 1 }
 0x421   : > { %v1734_v2 = vsel %vm1712_vm9, %v1711_v49, 0.0 }
 0x422   : > { %v1733_v50 = vadd.f32 %v1732_v0, %v1731_v62  ;;  %v1735_v3 = vrot.slane %v1734_v2, 4 }
 0x424   : > { %v1736_v52 = vadd.f32 %v1735_v3, %v1734_v2  ;;  %v1763_v4 = vsel %vm1762_vm11, %v1733_v50, %v1761_v63 }
 0x426   : > { %v1737_v54 = vrot.slane %v1736_v52, 2 }
 0x428   : > { %v1738_v5 = vadd.f32 %v1737_v54, %v1736_v52 }
 0x42a   : > { %v1739_v8 = vrot.slane %v1738_v5, 1 }
 0x42c   : > { %v1740_v56 = vadd.f32 %v1739_v8, %v1738_v5 }
 0x42e   : > { %v1765_v1 = vsel %vm1764_vm12, %v1740_v56, %v1763_v4 }
 0x42f   : > { %2249 = vmatmul.mubr.msk.f32.vlgmr.msra.gmra.mrb[32].mxu0 %vm1268_vm6, %v1765_v1 }
 0x430   : > { %2326 = vmatpush3.bf16.msra.mxu0 %v2325_v9  ;;  %2259 = vmatprep.mubr.msk.f32.mxu0 %vm2462_vm8, %v2463_v18 }
 0x431   : > { %2327 = vmatprep.subr.bf16.mxu0 %v2460_v48  ;;  %v2067_v48 = vld [vmem:[%s3208_s10] ss:$0 sm:$0xff] }
 0x434   : > { %2329 = vmatpush3.bf16.msra.mxu0 %v2328_v11 }
 0x502   : > { %v1834_v58 = vpop.f32.mrb[32].mxu0 }
 0x503   : > { %v1835_v13 = vadd.f32 %v2065_v12, %v1834_v58  ;;  %v2250_v60 = vpop.f32.mrb[33].mxu0 }
 0x505   : > { %v1838_v14 = vmax.f32 %v1835_v13, 0.0 }
 0x507   : > { %2260 = vmatmul.mubr.msk.f32.vlgmr.msra.gmra.mrb[34].mxu0 %vm1242_vm3, %v1838_v14 }
 0x5da   : > { %v1919_v15 = vpop.f32.mrb[34].mxu0 }
 0x5db   : > { %v1920_v16 = vadd.f32 %v2067_v48, %v1919_v15  ;;  %v2261_v17 = vpop.f32.mrb[35].mxu0 }
 0x5dd   : > { %1923 = vst [vmem:[%s544_s30] sm:$0xf] %v1920_v16 }
 0x5de   : > { %2405 = shalt.err (!%p2402_p5)
}
 0x5df   : > { %s2406_s25 = scalar_lea.hbm %s3154_s24, 64  ;;  %s2410_s16 = scalar_lea.hbm %s3209_s11, 128 }
 0x5e0   : > { %p2407_p7 = scmp.ne.s32.totalorder %s3154_s24, %s2406_s25  ;;  %p2411_p12 = scmp.lt.u32.totalorder %s3154_s24, %s3209_s11 }
 0x5e1   : > { %p2412_p13 = scmp.lt.u32.totalorder %s2410_s16, %s2406_s25  ;;  %p2414_p1 = scmp.lt.u32.totalorder %s2406_s25, %s3154_s24 }
 0x5e2   : > { %p2408_p10 = pnand %p2407_p7, %p2563_p6 }
 0x5e3   : > { %p2413_p0 = por %p2412_p13, %p2411_p12 }
 0x5e4   : > { %p2409_p11 = pneg %p2408_p10 }
 0x5e5   : > { %p2415_p2 = por %p2414_p1, %p2413_p0 }
 0x5e7   : > { %p2416_p3 = pnand %p2415_p2, %p2409_p11 }
 0x5e9   : > { %2419 = shalt.err (!%p2416_p3)
}
 0x5ea   : > { %2330 = dma.vmem_to_hbm [thread:$0]  (%p2563_p6), %s3156_s12, 64, %s3154_s24, %s1925_s15  }
 0x5eb PF: > { %s1950_s0 = sand.u32 1, %s2442_s17   ;;  %p2333_p4 = pnand %p2005_p9, %p2567_p8 }
 0x5ec   : > { %s1951_s13 = scalar_lea.sflag [#allocation6], %s1950_s0 }
 0x5ed   : > { %2437 = dma.done.wait (!%p2333_p4), %s1951_s13, 64  }
 0x5ee   : > { %2439 = vsyncadd (!%p2333_p4), %s1951_s13, 4294967232  ;;  %p21_p5 = scmp.ge.s32.totalorder %s2548_s23, 4   ;;  %s3218_s17 = smov %s2446_s18 }
 0x5ef   : > { %s3219_s18 = smov %s2450_s19  ;;  %s3220_s19 = smov %s2561_s26 }
 0x5f0   : > { %s3221_s20 = smov %s2548_s23  ;;  %23 = sbr.rel (!%p21_p5) target bundleno = 5 (0x5), region = 162 }
 0x5f7   :  { %1956 = vsyncpa [#allocation6], 1 }
 0x5f8   :  { %1958 = vsyncpa [#allocation6 + $0x1], 1 }

</bundles_post_ra>
